<compile_context>
chip_gen: v6e
topology: v6e:2x2x1
jax: 0.10.0
libtpu: 0.0.40
codegen_flags: <defaults>
</compile_context>

<pallas_src>
import functools
import numpy as np
import jax
import jax.numpy as jnp
from jax.experimental import pallas as pl
from jax.experimental.pallas import tpu as pltpu


# ----------------------------- host-side helpers -----------------------------
def position_encoding(max_len, d_model, pad_idx=None):
    pe = np.asarray(
        [[pos / np.power(10000, 2.0 * (i // 2) / d_model) for i in range(d_model)]
         for pos in range(max_len)], dtype=np.float32)
    pe[:, 0::2] = np.sin(pe[:, 0::2])
    pe[:, 1::2] = np.cos(pe[:, 1::2])
    if pad_idx is not None:
        pe[pad_idx] = 0.0
    return pe


def _layer_norm(x, gamma, beta, eps=1e-6):
    # module spec uses eps=1e-6 explicitly (not the nn.LayerNorm default 1e-5)
    mean = jnp.mean(x, axis=-1, keepdims=True)
    var = jnp.mean((x - mean) ** 2, axis=-1, keepdims=True)
    return (x - mean) * jax.lax.rsqrt(var + eps) * gamma + beta


# --------------------------------- kernel ------------------------------------
def encoder_stack_kernel(x_ref, pe_ref, tg_ref, tb_ref, kb_ref, sm_ref,
                         wq_ref, bq_ref, wk_ref, bk_ref, wv_ref, bv_ref,
                         wo_ref, bo_ref, g1_ref, be1_ref,
                         w1_ref, bf1_ref, w2_ref, bf2_ref, g2_ref, be2_ref,
                         o_ref, *, nb_heads, d_k, d_v, mxu_dtype, approx_softmax):
    l = pl.program_id(1)                      # innermost grid axis = layer
    Bb, S, D = x_ref.shape
    BS = Bb * S
    cd = mxu_dtype

    # --- layer 0 only: fused pos-encoding add + top LayerNorm seeds the
    #     VMEM-resident activation living in o_ref for the whole layer loop ---
    @pl.when(l == 0)
    def _():
        xin = (x_ref[...] + pe_ref[...][None, :, :]).reshape(BS, D)
        o_ref[...] = _layer_norm(xin, tg_ref[...], tb_ref[...])

    x = o_ref[...]                            # (Bb*S, D) f32 resident activation
    seq_mask = sm_ref[...]                    # (Bb*S, 1)  1.0 = keep, 0.0 = pad
    att_bias = kb_ref[...]                    # (Bb, 1, S) additive {0, -1e9} f32

    def mm(a, w):                             # activations cast to MXU dtype,
        return jnp.dot(a.astype(cd), w,       # weights arrive pre-cast,
                       preferred_element_type=jnp.float32)  # accumulate in f32

    # --- multi-head attention: fused QKV on the wide (Bb*S, D) slab ----------
    q = mm(x, wq_ref[0]) + bq_ref[0]
    k = mm(x, wk_ref[0]) + bk_ref[0]
    v = mm(x, wv_ref[0]) + bv_ref[0]
    q3 = q.reshape(Bb, S, nb_heads * d_k)
    k3 = k.reshape(Bb, S, nb_heads * d_k)
    v3 = v.reshape(Bb, S, nb_heads * d_v)

    scale = 1.0 / (d_k ** 0.5)
    heads = []
    # TODO(synk): at production sizes (d_k multiple of 128, large S) replace
    # this static per-head loop with a head-batched lax.dot_general and a
    # flash-style KV-block loop so the (S,S) scores are never fully materialized.
    for h in range(nb_heads):
        qh = q3[:, :, h * d_k:(h + 1) * d_k].astype(cd)
        kh = k3[:, :, h * d_k:(h + 1) * d_k].astype(cd)
        vh = v3[:, :, h * d_v:(h + 1) * d_v].astype(cd)
        # contraction on the LAST dims of both operands -> no XLU transpose of K
        s = jnp.einsum('bqd,bkd->bqk', qh, kh,
                       preferred_element_type=jnp.float32) * scale    # (Bb,S,S)
        s = s + att_bias                      # additive key-pad bias (kept f32)
        m = jnp.max(s, axis=-1, keepdims=True)
        e = jnp.exp(s - m)
        denom = jnp.sum(e, axis=-1, keepdims=True)
        if approx_softmax:
            p = e * pl.reciprocal(denom, approx=True)   # EUP slot, frees VALU
        else:
            p = e / denom                     # exact: 1e-4 parity on the f32 path
        heads.append(jnp.einsum('bqk,bkd->bqd', p.astype(cd), vh,
                                preferred_element_type=jnp.float32))   # (Bb,S,dv)

    # concatenate heads -> ONE wide output projection (Bb*S, H*dv) @ (H*dv, D)
    att = jnp.concatenate(heads, axis=-1).reshape(BS, nb_heads * d_v)
    mh = mm(att, wo_ref[0]) + bo_ref[0]

    # residual + LayerNorm + seq mask (f32 elementwise path)
    y = _layer_norm(x + mh, g1_ref[0], be1_ref[0]) * seq_mask

    # --- position-wise feed-forward -------------------------------------------
    h1 = jnp.maximum(mm(y, w1_ref[0]) + bf1_ref[0], 0.0)
    ff = mm(h1, w2_ref[0]) + bf2_ref[0]
    o_ref[...] = _layer_norm(ff + y, g2_ref[0], be2_ref[0]) * seq_mask
    # o_ref's block index is constant across the layer axis, so the HBM
    # writeback happens only once per batch block (after the last layer).


# ------------------------------ pallas wrapper --------------------------------
def transformer_encoder(x, non_pad_mask, pe, top_g, top_b, stacked,
                        nb_heads, d_k, d_v, *,
                        mxu_dtype=jnp.float32, batch_block=None,
                        approx_softmax=None, vmem_limit_bytes=None):
    B, S, D = x.shape
    L = stacked["wq"].shape[0]
    HDk = stacked["wq"].shape[2]
    HDv = stacked["wv"].shape[2]
    Dff = stacked["w1"].shape[2]

    if batch_block is None:
        batch_block = B                      # weights streamed once (v5e/v6e)
    assert B % batch_block == 0
    Bb = batch_block
    nb_blocks = B // Bb                      # "parallel" axis (v7x: 2 TCs)

    if approx_softmax is None:
        approx_softmax = (jnp.dtype(mxu_dtype) == jnp.dtype(jnp.bfloat16))

    # weight MATRICES in the MXU dtype (halves weight DMA bytes for bf16);
    # biases / LayerNorm params stay f32 so the VPU/EUP path stays f32.
    mats = ("wq", "wk", "wv", "wo", "w1", "w2")
    wts = {kk: (vv.astype(mxu_dtype) if kk in mats else vv.astype(jnp.float32))
           for kk, vv in stacked.items()}

    # masks laid out host-side: additive key-pad bias + query seq mask
    att_bias = jnp.where(non_pad_mask == 0, -1e9, 0.0).astype(jnp.float32)[:, None, :]
    seq_mask = non_pad_mask.astype(jnp.float32).reshape(B * S, 1)

    def const_spec(shape):
        n = len(shape)
        return pl.BlockSpec(shape, lambda b, l, _n=n: (0,) * _n)

    def batch_spec(shape):
        n = len(shape)
        return pl.BlockSpec(shape, lambda b, l, _n=n: (b,) + (0,) * (_n - 1))

    def layer_spec(shape):
        n = len(shape)
        return pl.BlockSpec(shape, lambda b, l, _n=n: (l,) + (0,) * (_n - 1))

    kern = functools.partial(encoder_stack_kernel,
                             nb_heads=nb_heads, d_k=d_k, d_v=d_v,
                             mxu_dtype=mxu_dtype, approx_softmax=approx_softmax)

    cp_kwargs = dict(dimension_semantics=("parallel", "arbitrary"))
    if vmem_limit_bytes is not None:         # raise for production sizes (v6e)
        cp_kwargs["vmem_limit_bytes"] = vmem_limit_bytes

    out2d = pl.pallas_call(
        kern,
        out_shape=jax.ShapeDtypeStruct((B * S, D), jnp.float32),
        grid=(nb_blocks, L),
        in_specs=[
            batch_spec((Bb, S, D)),                    # x (embeddings)
            const_spec((S, D)),                        # positional encoding
            const_spec((1, D)), const_spec((1, D)),    # top LN gamma/beta
            batch_spec((Bb, 1, S)),                    # additive key-pad bias
            batch_spec((Bb * S, 1)),                   # query seq mask
            layer_spec((1, D, HDk)), layer_spec((1, 1, HDk)),   # wq, bq
            layer_spec((1, D, HDk)), layer_spec((1, 1, HDk)),   # wk, bk
            layer_spec((1, D, HDv)), layer_spec((1, 1, HDv)),   # wv, bv
            layer_spec((1, HDv, D)), layer_spec((1, 1, D)),     # wo, bo
            layer_spec((1, 1, D)), layer_spec((1, 1, D)),       # ln1 g, b
            layer_spec((1, D, Dff)), layer_spec((1, 1, Dff)),   # w1, b1
            layer_spec((1, Dff, D)), layer_spec((1, 1, D)),     # w2, b2
            layer_spec((1, 1, D)), layer_spec((1, 1, D)),       # ln2 g, b
        ],
        # constant block index across the (innermost) layer axis -> o_ref is the
        # VMEM-resident activation; HBM writeback only when the batch block ends.
        out_specs=pl.BlockSpec((Bb * S, D), lambda b, l: (b, 0)),
        compiler_params=pltpu.CompilerParams(**cp_kwargs),
    )(x, pe[:S], top_g, top_b, att_bias, seq_mask,
      wts["wq"], wts["bq"], wts["wk"], wts["bk"],
      wts["wv"], wts["bv"], wts["wo"], wts["bo"],
      wts["g1"], wts["be1"], wts["w1"], wts["bf1"],
      wts["w2"], wts["bf2"], wts["g2"], wts["be2"])
    return out2d.reshape(B, S, D)


# ------------------------- deterministic parameter init ----------------------
def init_params(key, nb_layers, d_model, d_k, d_v, nb_heads, d_ff):
    def xavier(k, shape, gain=1.0):
        fan_in, fan_out = shape
        bound = gain * float(np.sqrt(6.0 / (fan_in + fan_out)))
        return jax.random.uniform(k, shape, jnp.float32, -bound, bound)

    HDk, HDv = d_k * nb_heads, d_v * nb_heads
    layers = []
    for l in range(nb_layers):
        ks = jax.random.split(jax.random.fold_in(key, l), 12)
        g = 1.0 / np.sqrt(2.0)
        layers.append(dict(
            wq=xavier(ks[0], (d_model, HDk), g),
            bq=0.01 * jax.random.normal(ks[1], (1, HDk), jnp.float32),
            wk=xavier(ks[2], (d_model, HDk), g),
            bk=0.01 * jax.random.normal(ks[3], (1, HDk), jnp.float32),
            wv=xavier(ks[4], (d_model, HDv), g),
            bv=0.01 * jax.random.normal(ks[5], (1, HDv), jnp.float32),
            wo=xavier(ks[6], (HDv, d_model)),
            bo=0.01 * jax.random.normal(ks[7], (1, d_model), jnp.float32),
            g1=jnp.ones((1, d_model), jnp.float32),
            be1=jnp.zeros((1, d_model), jnp.float32),
            w1=xavier(ks[8], (d_model, d_ff)),
            bf1=0.01 * jax.random.normal(ks[9], (1, d_ff), jnp.float32),
            w2=xavier(ks[10], (d_ff, d_model)),
            bf2=0.01 * jax.random.normal(ks[11], (1, d_model), jnp.float32),
            g2=jnp.ones((1, d_model), jnp.float32),
            be2=jnp.zeros((1, d_model), jnp.float32),
        ))
    return layers


def stack_layer_params(layers):
    return {k: jnp.stack([lp[k] for lp in layers], axis=0)
            for k in layers[0].keys()}


# ------------------------------ pure-JAX reference ----------------------------
def reference_forward(x, non_pad_mask, pe, top_g, top_b, layer_params,
                      nb_heads, d_k, d_v, mxu_dtype=jnp.float32):
    cd = mxu_dtype

    def ein(eq, a, b):
        return jnp.einsum(eq, a.astype(cd), b.astype(cd),
                          preferred_element_type=jnp.float32)

    B, S, D = x.shape
    out = _layer_norm(x + pe[None, :S], top_g[0], top_b[0])
    key_pad = (non_pad_mask == 0)
    seq_mask = non_pad_mask[:, :, None].astype(jnp.float32)
    for p in layer_params:
        q = ein("bsd,df->bsf", out, p["wq"]) + p["bq"][0]
        k = ein("bsd,df->bsf", out, p["wk"]) + p["bk"][0]
        v = ein("bsd,df->bsf", out, p["wv"]) + p["bv"][0]

        def split(t, dh):
            return t.reshape(B, S, nb_heads, dh).transpose(0, 2, 1, 3)

        qh, kh, vh = split(q, d_k), split(k, d_k), split(v, d_v)
        s = ein("bhqd,bhkd->bhqk", qh, kh) * (1.0 / np.sqrt(d_k))
        s = jnp.where(key_pad[:, None, None, :], -1e9, s)
        p_att = jax.nn.softmax(s, axis=-1)
        att = ein("bhqk,bhkd->bhqd", p_att, vh)
        att = att.transpose(0, 2, 1, 3).reshape(B, S, -1)
        mh = ein("bsd,df->bsf", att, p["wo"]) + p["bo"][0]
        y = _layer_norm(out + mh, p["g1"][0], p["be1"][0]) * seq_mask
        h1 = jnp.maximum(ein("bsd,df->bsf", y, p["w1"]) + p["bf1"][0], 0.0)
        ff = ein("bsd,df->bsf", h1, p["w2"]) + p["bf2"][0]
        out = _layer_norm(ff + y, p["g2"][0], p["be2"][0]) * seq_mask
    return out


# ----------------------------------- main -------------------------------------
if __name__ == "__main__":
    B, S, D = 2, 8, 32
    nb_heads, nb_layers, d_ff, max_pos = 4, 2, 64, 16
    d_k = d_v = D // nb_heads

    key = jax.random.PRNGKey(0)
    kx, kp = jax.random.split(key)
    x = jax.random.normal(kx, (B, S, D), jnp.float32)
    non_pad_mask = jnp.array([[1, 1, 1, 1, 1, 1, 1, 1],
                              [1, 1, 1, 1, 1, 0, 0, 0]], jnp.float32)

    pe = jnp.asarray(position_encoding(max_pos, D, pad_idx=0))
    top_g = jnp.ones((1, D), jnp.float32)
    top_b = jnp.zeros((1, D), jnp.float32)
    layer_params = init_params(kp, nb_layers, D, d_k, d_v, nb_heads, d_ff)
    stacked = stack_layer_params(layer_params)

    # 1) f32 MXU path, whole batch per grid step (weights streamed once):
    #    strict 1e-4 parity with the f32 reference.
    out_f32 = transformer_encoder(x, non_pad_mask, pe, top_g, top_b, stacked,
                                  nb_heads, d_k, d_v,
                                  mxu_dtype=jnp.float32, batch_block=B)
    out_f32 = jax.block_until_ready(out_f32)
    ref_f32 = reference_forward(x, non_pad_mask, pe, top_g, top_b, layer_params,
                                nb_heads, d_k, d_v, mxu_dtype=jnp.float32)
    np.testing.assert_allclose(np.asarray(out_f32), np.asarray(ref_f32),
                               rtol=1e-4, atol=1e-4)

    # 2) bf16 MXU operands + bf16 weight streaming + approx softmax reciprocal,
    #    with a parallel per-batch grid axis (v7x-style); checked against a
    #    bf16-matmul-matched reference at a bf16-appropriate tolerance.
    out_bf16 = transformer_encoder(x, non_pad_mask, pe, top_g, top_b, stacked,
                                   nb_heads, d_k, d_v,
                                   mxu_dtype=jnp.bfloat16, batch_block=1)
    out_bf16 = jax.block_until_ready(out_bf16)
    ref_bf16 = reference_forward(x, non_pad_mask, pe, top_g, top_b, layer_params,
                                 nb_heads, d_k, d_v, mxu_dtype=jnp.bfloat16)
    np.testing.assert_allclose(np.asarray(out_bf16), np.asarray(ref_bf16),
                               rtol=5e-2, atol=5e-2)

    print("KERNEL_OK")
</pallas_src>

<mosaic_0001>
module attributes {stable_mosaic.version = 11 : i64} {
  func.func @encoder_stack_kernel(%arg0: i32, %arg1: i32, %arg2: memref<2x8x32xf32, #tpu.memory_space<vmem>>, %arg3: memref<8x32xf32, #tpu.memory_space<vmem>>, %arg4: memref<1x32xf32, #tpu.memory_space<vmem>>, %arg5: memref<1x32xf32, #tpu.memory_space<vmem>>, %arg6: memref<2x1x8xf32, #tpu.memory_space<vmem>>, %arg7: memref<16x1xf32, #tpu.memory_space<vmem>>, %arg8: memref<1x32x32xf32, #tpu.memory_space<vmem>>, %arg9: memref<1x1x32xf32, #tpu.memory_space<vmem>>, %arg10: memref<1x32x32xf32, #tpu.memory_space<vmem>>, %arg11: memref<1x1x32xf32, #tpu.memory_space<vmem>>, %arg12: memref<1x32x32xf32, #tpu.memory_space<vmem>>, %arg13: memref<1x1x32xf32, #tpu.memory_space<vmem>>, %arg14: memref<1x32x32xf32, #tpu.memory_space<vmem>>, %arg15: memref<1x1x32xf32, #tpu.memory_space<vmem>>, %arg16: memref<1x1x32xf32, #tpu.memory_space<vmem>>, %arg17: memref<1x1x32xf32, #tpu.memory_space<vmem>>, %arg18: memref<1x32x64xf32, #tpu.memory_space<vmem>>, %arg19: memref<1x1x64xf32, #tpu.memory_space<vmem>>, %arg20: memref<1x64x32xf32, #tpu.memory_space<vmem>>, %arg21: memref<1x1x32xf32, #tpu.memory_space<vmem>>, %arg22: memref<1x1x32xf32, #tpu.memory_space<vmem>>, %arg23: memref<1x1x32xf32, #tpu.memory_space<vmem>>, %arg24: memref<16x32xf32, #tpu.memory_space<vmem>>) attributes {dimension_semantics = [#tpu.dimension_semantics<parallel>, #tpu.dimension_semantics<arbitrary>], iteration_bounds = array<i64: 1, 2>, scalar_prefetch = 0 : i64, scratch_operands = 0 : i64, tpu.core_type = #tpu.core_type<tc>, window_params = [{transform_indices = @transform_0, window_bounds = array<i64: 2, 8, 32>}, {pipeline_mode = #tpu.pipeline_mode<synchronous>, transform_indices = @transform_1, window_bounds = array<i64: 8, 32>}, {pipeline_mode = #tpu.pipeline_mode<synchronous>, transform_indices = @transform_2, window_bounds = array<i64: 1, 32>}, {pipeline_mode = #tpu.pipeline_mode<synchronous>, transform_indices = @transform_3, window_bounds = array<i64: 1, 32>}, {transform_indices = @transform_4, window_bounds = array<i64: 2, 1, 8>}, {transform_indices = @transform_5, window_bounds = array<i64: 16, 1>}, {transform_indices = @transform_6, window_bounds = array<i64: 1, 32, 32>}, {transform_indices = @transform_7, window_bounds = array<i64: 1, 1, 32>}, {transform_indices = @transform_8, window_bounds = array<i64: 1, 32, 32>}, {transform_indices = @transform_9, window_bounds = array<i64: 1, 1, 32>}, {transform_indices = @transform_10, window_bounds = array<i64: 1, 32, 32>}, {transform_indices = @transform_11, window_bounds = array<i64: 1, 1, 32>}, {transform_indices = @transform_12, window_bounds = array<i64: 1, 32, 32>}, {transform_indices = @transform_13, window_bounds = array<i64: 1, 1, 32>}, {transform_indices = @transform_14, window_bounds = array<i64: 1, 1, 32>}, {transform_indices = @transform_15, window_bounds = array<i64: 1, 1, 32>}, {transform_indices = @transform_16, window_bounds = array<i64: 1, 32, 64>}, {transform_indices = @transform_17, window_bounds = array<i64: 1, 1, 64>}, {transform_indices = @transform_18, window_bounds = array<i64: 1, 64, 32>}, {transform_indices = @transform_19, window_bounds = array<i64: 1, 1, 32>}, {transform_indices = @transform_20, window_bounds = array<i64: 1, 1, 32>}, {transform_indices = @transform_21, window_bounds = array<i64: 1, 1, 32>}, {transform_indices = @transform_22, window_bounds = array<i64: 16, 32>}]} {
    %c0_i32 = arith.constant 0 : i32
    %0 = arith.cmpi eq, %arg1, %c0_i32 : i32
    %1 = arith.extui %0 : i1 to i32
    %c0_i32_0 = arith.constant 0 : i32
    %2 = arith.cmpi ne, %1, %c0_i32_0 : i32
    scf.if %2 {
      %c0_93 = arith.constant 0 : index
      %c0_94 = arith.constant 0 : index
      %c0_95 = arith.constant 0 : index
      %186 = vector.load %arg2[%c0_93, %c0_94, %c0_95] : memref<2x8x32xf32, #tpu.memory_space<vmem>>, vector<2x8x32xf32>
      %c0_96 = arith.constant 0 : index
      %c0_97 = arith.constant 0 : index
      %187 = vector.load %arg3[%c0_96, %c0_97] : memref<8x32xf32, #tpu.memory_space<vmem>>, vector<8x32xf32>
      %188 = vector.shape_cast %187 : vector<8x32xf32> to vector<1x8x32xf32>
      %189 = vector.broadcast %188 : vector<1x8x32xf32> to vector<2x8x32xf32>
      %190 = arith.addf %186, %189 : vector<2x8x32xf32>
      %191 = vector.shape_cast %190 : vector<2x8x32xf32> to vector<16x32xf32>
      %c0_98 = arith.constant 0 : index
      %c0_99 = arith.constant 0 : index
      %192 = vector.load %arg4[%c0_98, %c0_99] : memref<1x32xf32, #tpu.memory_space<vmem>>, vector<1x32xf32>
      %c0_100 = arith.constant 0 : index
      %c0_101 = arith.constant 0 : index
      %193 = vector.load %arg5[%c0_100, %c0_101] : memref<1x32xf32, #tpu.memory_space<vmem>>, vector<1x32xf32>
      %cst_102 = arith.constant dense<0.000000e+00> : vector<16xf32>
      %194 = vector.multi_reduction <add>, %191, %cst_102 [1] : vector<16x32xf32> to vector<16xf32>
      %195 = vector.shape_cast %194 : vector<16xf32> to vector<16x1xf32>
      %cst_103 = arith.constant 3.200000e+01 : f32
      %196 = vector.broadcast %cst_103 : f32 to vector<16x1xf32>
      %197 = arith.divf %195, %196 : vector<16x1xf32>
      %198 = vector.broadcast %197 : vector<16x1xf32> to vector<16x32xf32>
      %199 = arith.subf %191, %198 : vector<16x32xf32>
      %200 = arith.mulf %199, %199 : vector<16x32xf32>
      %cst_104 = arith.constant dense<0.000000e+00> : vector<16xf32>
      %201 = vector.multi_reduction <add>, %200, %cst_104 [1] : vector<16x32xf32> to vector<16xf32>
      %202 = vector.shape_cast %201 : vector<16xf32> to vector<16x1xf32>
      %cst_105 = arith.constant 3.200000e+01 : f32
      %203 = vector.broadcast %cst_105 : f32 to vector<16x1xf32>
      %204 = arith.divf %202, %203 : vector<16x1xf32>
      %205 = vector.broadcast %197 : vector<16x1xf32> to vector<16x32xf32>
      %206 = arith.subf %191, %205 : vector<16x32xf32>
      %cst_106 = arith.constant 9.99999997E-7 : f32
      %207 = vector.broadcast %cst_106 : f32 to vector<16x1xf32>
      %208 = arith.addf %204, %207 : vector<16x1xf32>
      %209 = math.rsqrt %208 : vector<16x1xf32>
      %210 = vector.broadcast %209 : vector<16x1xf32> to vector<16x32xf32>
      %211 = arith.mulf %206, %210 : vector<16x32xf32>
      %212 = vector.broadcast %192 : vector<1x32xf32> to vector<16x32xf32>
      %213 = arith.mulf %211, %212 : vector<16x32xf32>
      %214 = vector.broadcast %193 : vector<1x32xf32> to vector<16x32xf32>
      %215 = arith.addf %213, %214 : vector<16x32xf32>
      %c0_107 = arith.constant 0 : index
      %c0_108 = arith.constant 0 : index
      %216 = vector.load %arg24[%c0_107, %c0_108] : memref<16x32xf32, #tpu.memory_space<vmem>>, vector<16x32xf32>
      tpu.vector_store %arg24[%c0_107, %c0_108], %215 {strides = array<i32>} : memref<16x32xf32, #tpu.memory_space<vmem>>, vector<16x32xf32>,
    } else {
    }
    %c0 = arith.constant 0 : index
    %c0_1 = arith.constant 0 : index
    %3 = vector.load %arg24[%c0, %c0_1] : memref<16x32xf32, #tpu.memory_space<vmem>>, vector<16x32xf32>
    %c0_2 = arith.constant 0 : index
    %c0_3 = arith.constant 0 : index
    %4 = vector.load %arg7[%c0_2, %c0_3] : memref<16x1xf32, #tpu.memory_space<vmem>>, vector<16x1xf32>
    %c0_4 = arith.constant 0 : index
    %c0_5 = arith.constant 0 : index
    %c0_6 = arith.constant 0 : index
    %5 = vector.load %arg6[%c0_4, %c0_5, %c0_6] : memref<2x1x8xf32, #tpu.memory_space<vmem>>, vector<2x1x8xf32>
    %c0_7 = arith.constant 0 : index
    %c0_8 = arith.constant 0 : index
    %c0_9 = arith.constant 0 : index
    %6 = vector.load %arg8[%c0_7, %c0_8, %c0_9] : memref<1x32x32xf32, #tpu.memory_space<vmem>>, vector<1x32x32xf32>
    %7 = vector.shape_cast %6 : vector<1x32x32xf32> to vector<32x32xf32>
    %cst = arith.constant dense<0.000000e+00> : vector<16x32xf32>
    %8 = tpu.matmul %3, %7, %cst {dimension_numbers = #tpu.dot_dimension_numbers<[1], [0], [0], [1], [0, 0, 1, 1], [], []>} : vector<16x32xf32>, vector<32x32xf32>, vector<16x32xf32> -> vector<16x32xf32>
    %c0_10 = arith.constant 0 : index
    %c0_11 = arith.constant 0 : index
    %c0_12 = arith.constant 0 : index
    %9 = vector.load %arg9[%c0_10, %c0_11, %c0_12] : memref<1x1x32xf32, #tpu.memory_space<vmem>>, vector<1x1x32xf32>
    %10 = vector.shape_cast %9 : vector<1x1x32xf32> to vector<1x32xf32>
    %11 = vector.broadcast %10 : vector<1x32xf32> to vector<16x32xf32>
    %12 = arith.addf %8, %11 : vector<16x32xf32>
    %c0_13 = arith.constant 0 : index
    %c0_14 = arith.constant 0 : index
    %c0_15 = arith.constant 0 : index
    %13 = vector.load %arg10[%c0_13, %c0_14, %c0_15] : memref<1x32x32xf32, #tpu.memory_space<vmem>>, vector<1x32x32xf32>
    %14 = vector.shape_cast %13 : vector<1x32x32xf32> to vector<32x32xf32>
    %cst_16 = arith.constant dense<0.000000e+00> : vector<16x32xf32>
    %15 = tpu.matmul %3, %14, %cst_16 {dimension_numbers = #tpu.dot_dimension_numbers<[1], [0], [0], [1], [0, 0, 1, 1], [], []>} : vector<16x32xf32>, vector<32x32xf32>, vector<16x32xf32> -> vector<16x32xf32>
    %c0_17 = arith.constant 0 : index
    %c0_18 = arith.constant 0 : index
    %c0_19 = arith.constant 0 : index
    %16 = vector.load %arg11[%c0_17, %c0_18, %c0_19] : memref<1x1x32xf32, #tpu.memory_space<vmem>>, vector<1x1x32xf32>
    %17 = vector.shape_cast %16 : vector<1x1x32xf32> to vector<1x32xf32>
    %18 = vector.broadcast %17 : vector<1x32xf32> to vector<16x32xf32>
    %19 = arith.addf %15, %18 : vector<16x32xf32>
    %c0_20 = arith.constant 0 : index
    %c0_21 = arith.constant 0 : index
    %c0_22 = arith.constant 0 : index
    %20 = vector.load %arg12[%c0_20, %c0_21, %c0_22] : memref<1x32x32xf32, #tpu.memory_space<vmem>>, vector<1x32x32xf32>
    %21 = vector.shape_cast %20 : vector<1x32x32xf32> to vector<32x32xf32>
    %cst_23 = arith.constant dense<0.000000e+00> : vector<16x32xf32>
    %22 = tpu.matmul %3, %21, %cst_23 {dimension_numbers = #tpu.dot_dimension_numbers<[1], [0], [0], [1], [0, 0, 1, 1], [], []>} : vector<16x32xf32>, vector<32x32xf32>, vector<16x32xf32> -> vector<16x32xf32>
    %c0_24 = arith.constant 0 : index
    %c0_25 = arith.constant 0 : index
    %c0_26 = arith.constant 0 : index
    %23 = vector.load %arg13[%c0_24, %c0_25, %c0_26] : memref<1x1x32xf32, #tpu.memory_space<vmem>>, vector<1x1x32xf32>
    %24 = vector.shape_cast %23 : vector<1x1x32xf32> to vector<1x32xf32>
    %25 = vector.broadcast %24 : vector<1x32xf32> to vector<16x32xf32>
    %26 = arith.addf %22, %25 : vector<16x32xf32>
    %27 = vector.shape_cast %12 : vector<16x32xf32> to vector<2x8x32xf32>
    %28 = vector.shape_cast %19 : vector<16x32xf32> to vector<2x8x32xf32>
    %29 = vector.shape_cast %26 : vector<16x32xf32> to vector<2x8x32xf32>
    %30 = vector.extract_strided_slice %27 {offsets = [0, 0, 0], sizes = [2, 8, 8], strides = [1, 1, 1]} : vector<2x8x32xf32> to vector<2x8x8xf32>
    %31 = vector.extract_strided_slice %28 {offsets = [0, 0, 0], sizes = [2, 8, 8], strides = [1, 1, 1]} : vector<2x8x32xf32> to vector<2x8x8xf32>
    %32 = vector.extract_strided_slice %29 {offsets = [0, 0, 0], sizes = [2, 8, 8], strides = [1, 1, 1]} : vector<2x8x32xf32> to vector<2x8x8xf32>
    "tpu.trace_start"() <{level = 10 : i32, message = "bqd,bkd->bqk"}> : () -> ()
    %cst_27 = arith.constant dense<0.000000e+00> : vector<2x8x8xf32>
    %33 = tpu.matmul %30, %31, %cst_27 {dimension_numbers = #tpu.dot_dimension_numbers<[2], [2], [1], [1], [0, 0, 0, 1, 1, 1], [0], [0]>} : vector<2x8x8xf32>, vector<2x8x8xf32>, vector<2x8x8xf32> -> vector<2x8x8xf32>
    "tpu.trace_stop"() : () -> ()
    %cst_28 = arith.constant 0.353553385 : f32
    %34 = vector.broadcast %cst_28 : f32 to vector<2x8x8xf32>
    %35 = arith.mulf %33, %34 : vector<2x8x8xf32>
    %36 = vector.broadcast %5 : vector<2x1x8xf32> to vector<2x8x8xf32>
    %37 = arith.addf %35, %36 : vector<2x8x8xf32>
    %cst_29 = arith.constant dense<0xFF800000> : vector<2x8xf32>
    %38 = vector.multi_reduction <maximumf>, %37, %cst_29 [2] : vector<2x8x8xf32> to vector<2x8xf32>
    %39 = vector.shape_cast %38 : vector<2x8xf32> to vector<2x8x1xf32>
    %40 = vector.broadcast %39 : vector<2x8x1xf32> to vector<2x8x8xf32>
    %41 = arith.subf %37, %40 : vector<2x8x8xf32>
    %42 = math.exp %41 : vector<2x8x8xf32>
    %cst_30 = arith.constant dense<0.000000e+00> : vector<2x8xf32>
    %43 = vector.multi_reduction <add>, %42, %cst_30 [2] : vector<2x8x8xf32> to vector<2x8xf32>
    %44 = vector.shape_cast %43 : vector<2x8xf32> to vector<2x8x1xf32>
    %45 = vector.broadcast %44 : vector<2x8x1xf32> to vector<2x8x8xf32>
    %46 = arith.divf %42, %45 : vector<2x8x8xf32>
    "tpu.trace_start"() <{level = 10 : i32, message = "bqk,bkd->bqd"}> : () -> ()
    %cst_31 = arith.constant dense<0.000000e+00> : vector<2x8x8xf32>
    %47 = tpu.matmul %46, %32, %cst_31 {dimension_numbers = #tpu.dot_dimension_numbers<[2], [1], [1], [2], [0, 0, 0, 1, 1, 2], [0], [0]>} : vector<2x8x8xf32>, vector<2x8x8xf32>, vector<2x8x8xf32> -> vector<2x8x8xf32>
    "tpu.trace_stop"() : () -> ()
    %48 = vector.extract_strided_slice %27 {offsets = [0, 0, 8], sizes = [2, 8, 8], strides = [1, 1, 1]} : vector<2x8x32xf32> to vector<2x8x8xf32>
    %49 = vector.extract_strided_slice %28 {offsets = [0, 0, 8], sizes = [2, 8, 8], strides = [1, 1, 1]} : vector<2x8x32xf32> to vector<2x8x8xf32>
    %50 = vector.extract_strided_slice %29 {offsets = [0, 0, 8], sizes = [2, 8, 8], strides = [1, 1, 1]} : vector<2x8x32xf32> to vector<2x8x8xf32>
    "tpu.trace_start"() <{level = 10 : i32, message = "bqd,bkd->bqk"}> : () -> ()
    %cst_32 = arith.constant dense<0.000000e+00> : vector<2x8x8xf32>
    %51 = tpu.matmul %48, %49, %cst_32 {dimension_numbers = #tpu.dot_dimension_numbers<[2], [2], [1], [1], [0, 0, 0, 1, 1, 1], [0], [0]>} : vector<2x8x8xf32>, vector<2x8x8xf32>, vector<2x8x8xf32> -> vector<2x8x8xf32>
    "tpu.trace_stop"() : () -> ()
    %cst_33 = arith.constant 0.353553385 : f32
    %52 = vector.broadcast %cst_33 : f32 to vector<2x8x8xf32>
    %53 = arith.mulf %51, %52 : vector<2x8x8xf32>
    %54 = vector.broadcast %5 : vector<2x1x8xf32> to vector<2x8x8xf32>
    %55 = arith.addf %53, %54 : vector<2x8x8xf32>
    %cst_34 = arith.constant dense<0xFF800000> : vector<2x8xf32>
    %56 = vector.multi_reduction <maximumf>, %55, %cst_34 [2] : vector<2x8x8xf32> to vector<2x8xf32>
    %57 = vector.shape_cast %56 : vector<2x8xf32> to vector<2x8x1xf32>
    %58 = vector.broadcast %57 : vector<2x8x1xf32> to vector<2x8x8xf32>
    %59 = arith.subf %55, %58 : vector<2x8x8xf32>
    %60 = math.exp %59 : vector<2x8x8xf32>
    %cst_35 = arith.constant dense<0.000000e+00> : vector<2x8xf32>
    %61 = vector.multi_reduction <add>, %60, %cst_35 [2] : vector<2x8x8xf32> to vector<2x8xf32>
    %62 = vector.shape_cast %61 : vector<2x8xf32> to vector<2x8x1xf32>
    %63 = vector.broadcast %62 : vector<2x8x1xf32> to vector<2x8x8xf32>
    %64 = arith.divf %60, %63 : vector<2x8x8xf32>
    "tpu.trace_start"() <{level = 10 : i32, message = "bqk,bkd->bqd"}> : () -> ()
    %cst_36 = arith.constant dense<0.000000e+00> : vector<2x8x8xf32>
    %65 = tpu.matmul %64, %50, %cst_36 {dimension_numbers = #tpu.dot_dimension_numbers<[2], [1], [1], [2], [0, 0, 0, 1, 1, 2], [0], [0]>} : vector<2x8x8xf32>, vector<2x8x8xf32>, vector<2x8x8xf32> -> vector<2x8x8xf32>
    "tpu.trace_stop"() : () -> ()
    %66 = vector.extract_strided_slice %27 {offsets = [0, 0, 16], sizes = [2, 8, 8], strides = [1, 1, 1]} : vector<2x8x32xf32> to vector<2x8x8xf32>
    %67 = vector.extract_strided_slice %28 {offsets = [0, 0, 16], sizes = [2, 8, 8], strides = [1, 1, 1]} : vector<2x8x32xf32> to vector<2x8x8xf32>
    %68 = vector.extract_strided_slice %29 {offsets = [0, 0, 16], sizes = [2, 8, 8], strides = [1, 1, 1]} : vector<2x8x32xf32> to vector<2x8x8xf32>
    "tpu.trace_start"() <{level = 10 : i32, message = "bqd,bkd->bqk"}> : () -> ()
    %cst_37 = arith.constant dense<0.000000e+00> : vector<2x8x8xf32>
    %69 = tpu.matmul %66, %67, %cst_37 {dimension_numbers = #tpu.dot_dimension_numbers<[2], [2], [1], [1], [0, 0, 0, 1, 1, 1], [0], [0]>} : vector<2x8x8xf32>, vector<2x8x8xf32>, vector<2x8x8xf32> -> vector<2x8x8xf32>
    "tpu.trace_stop"() : () -> ()
    %cst_38 = arith.constant 0.353553385 : f32
    %70 = vector.broadcast %cst_38 : f32 to vector<2x8x8xf32>
    %71 = arith.mulf %69, %70 : vector<2x8x8xf32>
    %72 = vector.broadcast %5 : vector<2x1x8xf32> to vector<2x8x8xf32>
    %73 = arith.addf %71, %72 : vector<2x8x8xf32>
    %cst_39 = arith.constant dense<0xFF800000> : vector<2x8xf32>
    %74 = vector.multi_reduction <maximumf>, %73, %cst_39 [2] : vector<2x8x8xf32> to vector<2x8xf32>
    %75 = vector.shape_cast %74 : vector<2x8xf32> to vector<2x8x1xf32>
    %76 = vector.broadcast %75 : vector<2x8x1xf32> to vector<2x8x8xf32>
    %77 = arith.subf %73, %76 : vector<2x8x8xf32>
    %78 = math.exp %77 : vector<2x8x8xf32>
    %cst_40 = arith.constant dense<0.000000e+00> : vector<2x8xf32>
    %79 = vector.multi_reduction <add>, %78, %cst_40 [2] : vector<2x8x8xf32> to vector<2x8xf32>
    %80 = vector.shape_cast %79 : vector<2x8xf32> to vector<2x8x1xf32>
    %81 = vector.broadcast %80 : vector<2x8x1xf32> to vector<2x8x8xf32>
    %82 = arith.divf %78, %81 : vector<2x8x8xf32>
    "tpu.trace_start"() <{level = 10 : i32, message = "bqk,bkd->bqd"}> : () -> ()
    %cst_41 = arith.constant dense<0.000000e+00> : vector<2x8x8xf32>
    %83 = tpu.matmul %82, %68, %cst_41 {dimension_numbers = #tpu.dot_dimension_numbers<[2], [1], [1], [2], [0, 0, 0, 1, 1, 2], [0], [0]>} : vector<2x8x8xf32>, vector<2x8x8xf32>, vector<2x8x8xf32> -> vector<2x8x8xf32>
    "tpu.trace_stop"() : () -> ()
    %84 = vector.extract_strided_slice %27 {offsets = [0, 0, 24], sizes = [2, 8, 8], strides = [1, 1, 1]} : vector<2x8x32xf32> to vector<2x8x8xf32>
    %85 = vector.extract_strided_slice %28 {offsets = [0, 0, 24], sizes = [2, 8, 8], strides = [1, 1, 1]} : vector<2x8x32xf32> to vector<2x8x8xf32>
    %86 = vector.extract_strided_slice %29 {offsets = [0, 0, 24], sizes = [2, 8, 8], strides = [1, 1, 1]} : vector<2x8x32xf32> to vector<2x8x8xf32>
    "tpu.trace_start"() <{level = 10 : i32, message = "bqd,bkd->bqk"}> : () -> ()
    %cst_42 = arith.constant dense<0.000000e+00> : vector<2x8x8xf32>
    %87 = tpu.matmul %84, %85, %cst_42 {dimension_numbers = #tpu.dot_dimension_numbers<[2], [2], [1], [1], [0, 0, 0, 1, 1, 1], [0], [0]>} : vector<2x8x8xf32>, vector<2x8x8xf32>, vector<2x8x8xf32> -> vector<2x8x8xf32>
    "tpu.trace_stop"() : () -> ()
    %cst_43 = arith.constant 0.353553385 : f32
    %88 = vector.broadcast %cst_43 : f32 to vector<2x8x8xf32>
    %89 = arith.mulf %87, %88 : vector<2x8x8xf32>
    %90 = vector.broadcast %5 : vector<2x1x8xf32> to vector<2x8x8xf32>
    %91 = arith.addf %89, %90 : vector<2x8x8xf32>
    %cst_44 = arith.constant dense<0xFF800000> : vector<2x8xf32>
    %92 = vector.multi_reduction <maximumf>, %91, %cst_44 [2] : vector<2x8x8xf32> to vector<2x8xf32>
    %93 = vector.shape_cast %92 : vector<2x8xf32> to vector<2x8x1xf32>
    %94 = vector.broadcast %93 : vector<2x8x1xf32> to vector<2x8x8xf32>
    %95 = arith.subf %91, %94 : vector<2x8x8xf32>
    %96 = math.exp %95 : vector<2x8x8xf32>
    %cst_45 = arith.constant dense<0.000000e+00> : vector<2x8xf32>
    %97 = vector.multi_reduction <add>, %96, %cst_45 [2] : vector<2x8x8xf32> to vector<2x8xf32>
    %98 = vector.shape_cast %97 : vector<2x8xf32> to vector<2x8x1xf32>
    %99 = vector.broadcast %98 : vector<2x8x1xf32> to vector<2x8x8xf32>
    %100 = arith.divf %96, %99 : vector<2x8x8xf32>
    "tpu.trace_start"() <{level = 10 : i32, message = "bqk,bkd->bqd"}> : () -> ()
    %cst_46 = arith.constant dense<0.000000e+00> : vector<2x8x8xf32>
    %101 = tpu.matmul %100, %86, %cst_46 {dimension_numbers = #tpu.dot_dimension_numbers<[2], [1], [1], [2], [0, 0, 0, 1, 1, 2], [0], [0]>} : vector<2x8x8xf32>, vector<2x8x8xf32>, vector<2x8x8xf32> -> vector<2x8x8xf32>
    "tpu.trace_stop"() : () -> ()
    %102 = tpu.concatenate %47, %65, %83, %101 in 2 : vector<2x8x8xf32>, vector<2x8x8xf32>, vector<2x8x8xf32>, vector<2x8x8xf32> -> vector<2x8x32xf32>
    %103 = vector.shape_cast %102 : vector<2x8x32xf32> to vector<16x32xf32>
    %c0_47 = arith.constant 0 : index
    %c0_48 = arith.constant 0 : index
    %c0_49 = arith.constant 0 : index
    %104 = vector.load %arg14[%c0_47, %c0_48, %c0_49] : memref<1x32x32xf32, #tpu.memory_space<vmem>>, vector<1x32x32xf32>
    %105 = vector.shape_cast %104 : vector<1x32x32xf32> to vector<32x32xf32>
    %cst_50 = arith.constant dense<0.000000e+00> : vector<16x32xf32>
    %106 = tpu.matmul %103, %105, %cst_50 {dimension_numbers = #tpu.dot_dimension_numbers<[1], [0], [0], [1], [0, 0, 1, 1], [], []>} : vector<16x32xf32>, vector<32x32xf32>, vector<16x32xf32> -> vector<16x32xf32>
    %c0_51 = arith.constant 0 : index
    %c0_52 = arith.constant 0 : index
    %c0_53 = arith.constant 0 : index
    %107 = vector.load %arg15[%c0_51, %c0_52, %c0_53] : memref<1x1x32xf32, #tpu.memory_space<vmem>>, vector<1x1x32xf32>
    %108 = vector.shape_cast %107 : vector<1x1x32xf32> to vector<1x32xf32>
    %109 = vector.broadcast %108 : vector<1x32xf32> to vector<16x32xf32>
    %110 = arith.addf %106, %109 : vector<16x32xf32>
    %111 = arith.addf %3, %110 : vector<16x32xf32>
    %c0_54 = arith.constant 0 : index
    %c0_55 = arith.constant 0 : index
    %c0_56 = arith.constant 0 : index
    %112 = vector.load %arg16[%c0_54, %c0_55, %c0_56] : memref<1x1x32xf32, #tpu.memory_space<vmem>>, vector<1x1x32xf32>
    %113 = vector.shape_cast %112 : vector<1x1x32xf32> to vector<1x32xf32>
    %c0_57 = arith.constant 0 : index
    %c0_58 = arith.constant 0 : index
    %c0_59 = arith.constant 0 : index
    %114 = vector.load %arg17[%c0_57, %c0_58, %c0_59] : memref<1x1x32xf32, #tpu.memory_space<vmem>>, vector<1x1x32xf32>
    %115 = vector.shape_cast %114 : vector<1x1x32xf32> to vector<1x32xf32>
    %cst_60 = arith.constant dense<0.000000e+00> : vector<16xf32>
    %116 = vector.multi_reduction <add>, %111, %cst_60 [1] : vector<16x32xf32> to vector<16xf32>
    %117 = vector.shape_cast %116 : vector<16xf32> to vector<16x1xf32>
    %cst_61 = arith.constant 3.200000e+01 : f32
    %118 = vector.broadcast %cst_61 : f32 to vector<16x1xf32>
    %119 = arith.divf %117, %118 : vector<16x1xf32>
    %120 = vector.broadcast %119 : vector<16x1xf32> to vector<16x32xf32>
    %121 = arith.subf %111, %120 : vector<16x32xf32>
    %122 = arith.mulf %121, %121 : vector<16x32xf32>
    %cst_62 = arith.constant dense<0.000000e+00> : vector<16xf32>
    %123 = vector.multi_reduction <add>, %122, %cst_62 [1] : vector<16x32xf32> to vector<16xf32>
    %124 = vector.shape_cast %123 : vector<16xf32> to vector<16x1xf32>
    %cst_63 = arith.constant 3.200000e+01 : f32
    %125 = vector.broadcast %cst_63 : f32 to vector<16x1xf32>
    %126 = arith.divf %124, %125 : vector<16x1xf32>
    %127 = vector.broadcast %119 : vector<16x1xf32> to vector<16x32xf32>
    %128 = arith.subf %111, %127 : vector<16x32xf32>
    %cst_64 = arith.constant 9.99999997E-7 : f32
    %129 = vector.broadcast %cst_64 : f32 to vector<16x1xf32>
    %130 = arith.addf %126, %129 : vector<16x1xf32>
    %131 = math.rsqrt %130 : vector<16x1xf32>
    %132 = vector.broadcast %131 : vector<16x1xf32> to vector<16x32xf32>
    %133 = arith.mulf %128, %132 : vector<16x32xf32>
    %134 = vector.broadcast %113 : vector<1x32xf32> to vector<16x32xf32>
    %135 = arith.mulf %133, %134 : vector<16x32xf32>
    %136 = vector.broadcast %115 : vector<1x32xf32> to vector<16x32xf32>
    %137 = arith.addf %135, %136 : vector<16x32xf32>
    %138 = vector.broadcast %4 : vector<16x1xf32> to vector<16x32xf32>
    %139 = arith.mulf %137, %138 : vector<16x32xf32>
    %c0_65 = arith.constant 0 : index
    %c0_66 = arith.constant 0 : index
    %c0_67 = arith.constant 0 : index
    %140 = vector.load %arg18[%c0_65, %c0_66, %c0_67] : memref<1x32x64xf32, #tpu.memory_space<vmem>>, vector<1x32x64xf32>
    %141 = vector.shape_cast %140 : vector<1x32x64xf32> to vector<32x64xf32>
    %cst_68 = arith.constant dense<0.000000e+00> : vector<16x64xf32>
    %142 = tpu.matmul %139, %141, %cst_68 {dimension_numbers = #tpu.dot_dimension_numbers<[1], [0], [0], [1], [0, 0, 1, 1], [], []>} : vector<16x32xf32>, vector<32x64xf32>, vector<16x64xf32> -> vector<16x64xf32>
    %c0_69 = arith.constant 0 : index
    %c0_70 = arith.constant 0 : index
    %c0_71 = arith.constant 0 : index
    %143 = vector.load %arg19[%c0_69, %c0_70, %c0_71] : memref<1x1x64xf32, #tpu.memory_space<vmem>>, vector<1x1x64xf32>
    %144 = vector.shape_cast %143 : vector<1x1x64xf32> to vector<1x64xf32>
    %145 = vector.broadcast %144 : vector<1x64xf32> to vector<16x64xf32>
    %146 = arith.addf %142, %145 : vector<16x64xf32>
    %cst_72 = arith.constant 0.000000e+00 : f32
    %147 = vector.broadcast %cst_72 : f32 to vector<16x64xf32>
    %148 = arith.maximumf %146, %147 : vector<16x64xf32>
    %c0_73 = arith.constant 0 : index
    %c0_74 = arith.constant 0 : index
    %c0_75 = arith.constant 0 : index
    %149 = vector.load %arg20[%c0_73, %c0_74, %c0_75] : memref<1x64x32xf32, #tpu.memory_space<vmem>>, vector<1x64x32xf32>
    %150 = vector.shape_cast %149 : vector<1x64x32xf32> to vector<64x32xf32>
    %cst_76 = arith.constant dense<0.000000e+00> : vector<16x32xf32>
    %151 = tpu.matmul %148, %150, %cst_76 {dimension_numbers = #tpu.dot_dimension_numbers<[1], [0], [0], [1], [0, 0, 1, 1], [], []>} : vector<16x64xf32>, vector<64x32xf32>, vector<16x32xf32> -> vector<16x32xf32>
    %c0_77 = arith.constant 0 : index
    %c0_78 = arith.constant 0 : index
    %c0_79 = arith.constant 0 : index
    %152 = vector.load %arg21[%c0_77, %c0_78, %c0_79] : memref<1x1x32xf32, #tpu.memory_space<vmem>>, vector<1x1x32xf32>
    %153 = vector.shape_cast %152 : vector<1x1x32xf32> to vector<1x32xf32>
    %154 = vector.broadcast %153 : vector<1x32xf32> to vector<16x32xf32>
    %155 = arith.addf %151, %154 : vector<16x32xf32>
    %156 = arith.addf %155, %139 : vector<16x32xf32>
    %c0_80 = arith.constant 0 : index
    %c0_81 = arith.constant 0 : index
    %c0_82 = arith.constant 0 : index
    %157 = vector.load %arg22[%c0_80, %c0_81, %c0_82] : memref<1x1x32xf32, #tpu.memory_space<vmem>>, vector<1x1x32xf32>
    %158 = vector.shape_cast %157 : vector<1x1x32xf32> to vector<1x32xf32>
    %c0_83 = arith.constant 0 : index
    %c0_84 = arith.constant 0 : index
    %c0_85 = arith.constant 0 : index
    %159 = vector.load %arg23[%c0_83, %c0_84, %c0_85] : memref<1x1x32xf32, #tpu.memory_space<vmem>>, vector<1x1x32xf32>
    %160 = vector.shape_cast %159 : vector<1x1x32xf32> to vector<1x32xf32>
    %cst_86 = arith.constant dense<0.000000e+00> : vector<16xf32>
    %161 = vector.multi_reduction <add>, %156, %cst_86 [1] : vector<16x32xf32> to vector<16xf32>
    %162 = vector.shape_cast %161 : vector<16xf32> to vector<16x1xf32>
    %cst_87 = arith.constant 3.200000e+01 : f32
    %163 = vector.broadcast %cst_87 : f32 to vector<16x1xf32>
    %164 = arith.divf %162, %163 : vector<16x1xf32>
    %165 = vector.broadcast %164 : vector<16x1xf32> to vector<16x32xf32>
    %166 = arith.subf %156, %165 : vector<16x32xf32>
    %167 = arith.mulf %166, %166 : vector<16x32xf32>
    %cst_88 = arith.constant dense<0.000000e+00> : vector<16xf32>
    %168 = vector.multi_reduction <add>, %167, %cst_88 [1] : vector<16x32xf32> to vector<16xf32>
    %169 = vector.shape_cast %168 : vector<16xf32> to vector<16x1xf32>
    %cst_89 = arith.constant 3.200000e+01 : f32
    %170 = vector.broadcast %cst_89 : f32 to vector<16x1xf32>
    %171 = arith.divf %169, %170 : vector<16x1xf32>
    %172 = vector.broadcast %164 : vector<16x1xf32> to vector<16x32xf32>
    %173 = arith.subf %156, %172 : vector<16x32xf32>
    %cst_90 = arith.constant 9.99999997E-7 : f32
    %174 = vector.broadcast %cst_90 : f32 to vector<16x1xf32>
    %175 = arith.addf %171, %174 : vector<16x1xf32>
    %176 = math.rsqrt %175 : vector<16x1xf32>
    %177 = vector.broadcast %176 : vector<16x1xf32> to vector<16x32xf32>
    %178 = arith.mulf %173, %177 : vector<16x32xf32>
    %179 = vector.broadcast %158 : vector<1x32xf32> to vector<16x32xf32>
    %180 = arith.mulf %178, %179 : vector<16x32xf32>
    %181 = vector.broadcast %160 : vector<1x32xf32> to vector<16x32xf32>
    %182 = arith.addf %180, %181 : vector<16x32xf32>
    %183 = vector.broadcast %4 : vector<16x1xf32> to vector<16x32xf32>
    %184 = arith.mulf %182, %183 : vector<16x32xf32>
    %c0_91 = arith.constant 0 : index
    %c0_92 = arith.constant 0 : index
    %185 = vector.load %arg24[%c0_91, %c0_92] : memref<16x32xf32, #tpu.memory_space<vmem>>, vector<16x32xf32>
    tpu.vector_store %arg24[%c0_91, %c0_92], %184 {strides = array<i32>} : memref<16x32xf32, #tpu.memory_space<vmem>>, vector<16x32xf32>,
    return
  }
  func.func @transform_0(%arg0: i32, %arg1: i32) -> (i32, i32, i32) {
    %c0_i32 = arith.constant 0 : i32
    %c0_i32_0 = arith.constant 0 : i32
    %c0_i32_1 = arith.constant 0 : i32
    return %arg0, %c0_i32, %c0_i32_0 : i32, i32, i32
  }
  func.func @transform_1(%arg0: i32, %arg1: i32) -> (i32, i32) {
    %c0_i32 = arith.constant 0 : i32
    %c0_i32_0 = arith.constant 0 : i32
    %c0_i32_1 = arith.constant 0 : i32
    return %c0_i32, %c0_i32_0 : i32, i32
  }
  func.func @transform_2(%arg0: i32, %arg1: i32) -> (i32, i32) {
    %c0_i32 = arith.constant 0 : i32
    %c0_i32_0 = arith.constant 0 : i32
    %c0_i32_1 = arith.constant 0 : i32
    return %c0_i32, %c0_i32_0 : i32, i32
  }
  func.func @transform_3(%arg0: i32, %arg1: i32) -> (i32, i32) {
    %c0_i32 = arith.constant 0 : i32
    %c0_i32_0 = arith.constant 0 : i32
    %c0_i32_1 = arith.constant 0 : i32
    return %c0_i32, %c0_i32_0 : i32, i32
  }
  func.func @transform_4(%arg0: i32, %arg1: i32) -> (i32, i32, i32) {
    %c0_i32 = arith.constant 0 : i32
    %c0_i32_0 = arith.constant 0 : i32
    %c0_i32_1 = arith.constant 0 : i32
    return %arg0, %c0_i32, %c0_i32_0 : i32, i32, i32
  }
  func.func @transform_5(%arg0: i32, %arg1: i32) -> (i32, i32) {
    %c0_i32 = arith.constant 0 : i32
    %c0_i32_0 = arith.constant 0 : i32
    return %arg0, %c0_i32 : i32, i32
  }
  func.func @transform_6(%arg0: i32, %arg1: i32) -> (i32, i32, i32) {
    %c0_i32 = arith.constant 0 : i32
    %c0_i32_0 = arith.constant 0 : i32
    %c0_i32_1 = arith.constant 0 : i32
    return %arg1, %c0_i32, %c0_i32_0 : i32, i32, i32
  }
  func.func @transform_7(%arg0: i32, %arg1: i32) -> (i32, i32, i32) {
    %c0_i32 = arith.constant 0 : i32
    %c0_i32_0 = arith.constant 0 : i32
    %c0_i32_1 = arith.constant 0 : i32
    return %arg1, %c0_i32, %c0_i32_0 : i32, i32, i32
  }
  func.func @transform_8(%arg0: i32, %arg1: i32) -> (i32, i32, i32) {
    %c0_i32 = arith.constant 0 : i32
    %c0_i32_0 = arith.constant 0 : i32
    %c0_i32_1 = arith.constant 0 : i32
    return %arg1, %c0_i32, %c0_i32_0 : i32, i32, i32
  }
  func.func @transform_9(%arg0: i32, %arg1: i32) -> (i32, i32, i32) {
    %c0_i32 = arith.constant 0 : i32
    %c0_i32_0 = arith.constant 0 : i32
    %c0_i32_1 = arith.constant 0 : i32
    return %arg1, %c0_i32, %c0_i32_0 : i32, i32, i32
  }
  func.func @transform_10(%arg0: i32, %arg1: i32) -> (i32, i32, i32) {
    %c0_i32 = arith.constant 0 : i32
    %c0_i32_0 = arith.constant 0 : i32
    %c0_i32_1 = arith.constant 0 : i32
    return %arg1, %c0_i32, %c0_i32_0 : i32, i32, i32
  }
  func.func @transform_11(%arg0: i32, %arg1: i32) -> (i32, i32, i32) {
    %c0_i32 = arith.constant 0 : i32
    %c0_i32_0 = arith.constant 0 : i32
    %c0_i32_1 = arith.constant 0 : i32
    return %arg1, %c0_i32, %c0_i32_0 : i32, i32, i32
  }
  func.func @transform_12(%arg0: i32, %arg1: i32) -> (i32, i32, i32) {
    %c0_i32 = arith.constant 0 : i32
    %c0_i32_0 = arith.constant 0 : i32
    %c0_i32_1 = arith.constant 0 : i32
    return %arg1, %c0_i32, %c0_i32_0 : i32, i32, i32
  }
  func.func @transform_13(%arg0: i32, %arg1: i32) -> (i32, i32, i32) {
    %c0_i32 = arith.constant 0 : i32
    %c0_i32_0 = arith.constant 0 : i32
    %c0_i32_1 = arith.constant 0 : i32
    return %arg1, %c0_i32, %c0_i32_0 : i32, i32, i32
  }
  func.func @transform_14(%arg0: i32, %arg1: i32) -> (i32, i32, i32) {
    %c0_i32 = arith.constant 0 : i32
    %c0_i32_0 = arith.constant 0 : i32
    %c0_i32_1 = arith.constant 0 : i32
    return %arg1, %c0_i32, %c0_i32_0 : i32, i32, i32
  }
  func.func @transform_15(%arg0: i32, %arg1: i32) -> (i32, i32, i32) {
    %c0_i32 = arith.constant 0 : i32
    %c0_i32_0 = arith.constant 0 : i32
    %c0_i32_1 = arith.constant 0 : i32
    return %arg1, %c0_i32, %c0_i32_0 : i32, i32, i32
  }
  func.func @transform_16(%arg0: i32, %arg1: i32) -> (i32, i32, i32) {
    %c0_i32 = arith.constant 0 : i32
    %c0_i32_0 = arith.constant 0 : i32
    %c0_i32_1 = arith.constant 0 : i32
    return %arg1, %c0_i32, %c0_i32_0 : i32, i32, i32
  }
  func.func @transform_17(%arg0: i32, %arg1: i32) -> (i32, i32, i32) {
    %c0_i32 = arith.constant 0 : i32
    %c0_i32_0 = arith.constant 0 : i32
    %c0_i32_1 = arith.constant 0 : i32
    return %arg1, %c0_i32, %c0_i32_0 : i32, i32, i32
  }
  func.func @transform_18(%arg0: i32, %arg1: i32) -> (i32, i32, i32) {
    %c0_i32 = arith.constant 0 : i32
    %c0_i32_0 = arith.constant 0 : i32
    %c0_i32_1 = arith.constant 0 : i32
    return %arg1, %c0_i32, %c0_i32_0 : i32, i32, i32
  }
  func.func @transform_19(%arg0: i32, %arg1: i32) -> (i32, i32, i32) {
    %c0_i32 = arith.constant 0 : i32
    %c0_i32_0 = arith.constant 0 : i32
    %c0_i32_1 = arith.constant 0 : i32
    return %arg1, %c0_i32, %c0_i32_0 : i32, i32, i32
  }
  func.func @transform_20(%arg0: i32, %arg1: i32) -> (i32, i32, i32) {
    %c0_i32 = arith.constant 0 : i32
    %c0_i32_0 = arith.constant 0 : i32
    %c0_i32_1 = arith.constant 0 : i32
    return %arg1, %c0_i32, %c0_i32_0 : i32, i32, i32
  }
  func.func @transform_21(%arg0: i32, %arg1: i32) -> (i32, i32, i32) {
    %c0_i32 = arith.constant 0 : i32
    %c0_i32_0 = arith.constant 0 : i32
    %c0_i32_1 = arith.constant 0 : i32
    return %arg1, %c0_i32, %c0_i32_0 : i32, i32, i32
  }
  func.func @transform_22(%arg0: i32, %arg1: i32) -> (i32, i32) {
    %c0_i32 = arith.constant 0 : i32
    %c0_i32_0 = arith.constant 0 : i32
    return %arg0, %c0_i32 : i32, i32
  }
}

</mosaic_0001>

<bundles_post_ra>
// kernel: tpu_custom_call.1
= control target key start
LH: loop header
LB: loop body
LE: loop exit
PB: predicated region body
PF: predicated region fallthrough
CT: control target
= control target key end

     0   :  { %s4860_s0 = inlined_call_operand.vmem [shape: f32[2,8,32], index: 0, kind: input, shape index: {}]   ;;  %s4861_s1 = inlined_call_operand.hbm [shape: f32[8,32], index: 1, kind: input, shape index: {}]   ;;  %s4862_s2 = inlined_call_operand.hbm [shape: f32[1,32], index: 2, kind: input, shape index: {}]   ;;  %s4863_s3 = inlined_call_operand.hbm [shape: f32[1,32], index: 3, kind: input, shape index: {}]   ;;  %s4864_s4 = inlined_call_operand.vmem [shape: f32[2,1,8], index: 4, kind: input, shape index: {}]   ;;  %s4865_s5 = inlined_call_operand.vmem [shape: f32[16,1], index: 5, kind: input, shape index: {}]   ;;  %s4866_s6 = inlined_call_operand.vmem [shape: f32[2,32,32], index: 6, kind: input, shape index: {}]   ;;  %s4867_s7 = inlined_call_operand.vmem [shape: f32[2,1,32], index: 7, kind: input, shape index: {}]   ;;  %s4868_s8 = inlined_call_operand.vmem [shape: f32[2,32,32], index: 8, kind: input, shape index: {}]   ;;  %s4869_s9 = inlined_call_operand.vmem [shape: f32[2,1,32], index: 9, kind: input, shape index: {}]   ;;  %s4870_s10 = inlined_call_operand.vmem [shape: f32[2,32,32], index: 10, kind: input, shape index: {}]   ;;  %s4871_s11 = inlined_call_operand.vmem [shape: f32[2,1,32], index: 11, kind: input, shape index: {}]   ;;  %s4872_s12 = inlined_call_operand.hbm [shape: f32[2,32,32], index: 12, kind: input, shape index: {}]   ;;  %s4873_s13 = inlined_call_operand.vmem [shape: f32[2,1,32], index: 13, kind: input, shape index: {}]   ;;  %s4874_s14 = inlined_call_operand.vmem [shape: f32[2,1,32], index: 14, kind: input, shape index: {}]   ;;  %s4875_s15 = inlined_call_operand.vmem [shape: f32[2,1,32], index: 15, kind: input, shape index: {}]   ;;  %s4876_s16 = inlined_call_operand.hbm [shape: f32[2,32,64], index: 16, kind: input, shape index: {}]   ;;  %s4877_s17 = inlined_call_operand.vmem [shape: f32[2,1,64], index: 17, kind: input, shape index: {}]   ;;  %s4878_s18 = inlined_call_operand.vmem [shape: f32[2,64,32], index: 18, kind: input, shape index: {}]   ;;  %s4879_s19 = inlined_call_operand.vmem [shape: f32[2,1,32], index: 19, kind: input, shape index: {}]   ;;  %s4880_s20 = inlined_call_operand.vmem [shape: f32[2,1,32], index: 20, kind: input, shape index: {}]   ;;  %s4881_s21 = inlined_call_operand.vmem [shape: f32[2,1,32], index: 21, kind: input, shape index: {}]   ;;  %s4882_s22 = inlined_call_operand.hbm [shape: f32[16,32], index: 22, kind: output, shape index: {}]  }
   0x1   :  { %4896 = sst [smem:[#allocation23_spill]] %s4860_s0 }
   0x2   :  { %4897 = sst [smem:[#allocation24_spill]] %s4861_s1 }
   0x3   :  { %4898 = sst [smem:[#allocation25_spill]] %s4862_s2 }
   0x4   :  { %4899 = sst [smem:[#allocation26_spill]] %s4863_s3 }
   0x5   :  { %4900 = sst [smem:[#allocation27_spill]] %s4864_s4 }
   0x6   :  { %4901 = sst [smem:[#allocation28_spill]] %s4865_s5 }
   0x7   :  { %4902 = sst [smem:[#allocation29_spill]] %s4866_s6 }
   0x8   :  { %4903 = sst [smem:[#allocation30_spill]] %s4868_s8 }
   0x9   :  { %4904 = sst [smem:[#allocation31_spill]] %s4870_s10 }
   0xa   :  { %4905 = sst [smem:[#allocation32_spill]] %s4872_s12 }
   0xb   :  { %4906 = sst [smem:[#allocation33_spill]] %s4873_s13 }
   0xc   :  { %4907 = sst [smem:[#allocation34_spill]] %s4874_s14 }
   0xd   :  { %4908 = sst [smem:[#allocation35_spill]] %s4875_s15 }
   0xe   :  { %4909 = sst [smem:[#allocation36_spill]] %s4876_s16 }
   0xf   :  { %4910 = sst [smem:[#allocation37_spill]] %s4877_s17 }
  0x10   :  { %4911 = sst [smem:[#allocation38_spill]] %s4878_s18 }
  0x11   :  { %4912 = sst [smem:[#allocation39_spill]] %s4879_s19 }
  0x12   :  { %4913 = sst [smem:[#allocation40_spill]] %s4880_s20 }
  0x13   :  { %4914 = sst [smem:[#allocation41_spill]] %s4881_s21 }
  0x14   :  { %4915 = sst [smem:[#allocation42_spill]] %s4882_s22 }
  0x15   :  { %27 = vsyncpa [#allocation3], 0 }
  0x16   :  { %28 = vsyncpa [#allocation6], 0 }
  0x17   :  { %29 = vsyncpa [#allocation9], 0 }
  0x18   :  { %31 = vsyncpa [#allocation9 + $0x1], 0 }
  0x19   :  { %32 = vsyncpa [#allocation4], 0  ;;  %s4290_s3 = smov 0   ;;  %s4292_s28 = smov 0  }
  0x1a   :  { %s4294_s29 = smov 0   ;;  %s4296_s30 = smov 0  }
  0x1b   :  { %s4298_s4 = smov 0   ;;  %s4300_s0 = smov 0  }
  0x1c LB: > { %4916 = sst [smem:[#allocation16_spill]] %s4139_s28  ;;  %s4319_s23 = sadd.s32 4294967295, %s4155_s0   ;;  %s4155_s0 = sphi %s4300_s0, %s38_s0   ;;  %s4151_s4 = sphi %s4298_s4, %s4972_s4   ;;  %s4147_s30 = sphi %s4296_s30, %s4971_s30   ;;  %s4143_s29 = sphi %s4294_s29, %s4970_s29   ;;  %s4139_s28 = sphi %s4292_s28, %s4969_s28   ;;  %s4135_s3 = sphi %s4290_s3, %s4968_s3  }
  0x1d   : > { %4917 = sst [smem:[#allocation17_spill]] %s4143_s29  ;;  %p367_p0 = scmp.ne.s32.totalorder %s4139_s28, %s4135_s3 }
  0x1e   : > { %4918 = sst [smem:[#allocation18_spill]] %s4151_s4  ;;  %p4890_p1 = scmp.eq.s32.totalorder %s4319_s23, 0 }
  0x1f   : > { %4919 = sst [smem:[#allocation19_spill]] %s4155_s0  ;;  %p3464_p2 = scmp.ge.s32.totalorder %s4155_s0, 1 }
  0x20   : > { %4920 = sst [smem:[#allocation20_spill]] %s4319_s23  ;;  %p638_p3 = scmp.lt.s32.totalorder %s4155_s0, 3 }
  0x21   : > { %p4327_p4 = por %p4890_p1, %p367_p0  ;;  %s4157_s24 = smov [#allocation5]  }
  0x22   : > { %p4331_p5 = pnand %p3464_p2, %p638_p3  ;;  %s671_s6 = sshll.u32 %s4157_s24, 4  ;;  %s672_s6 = int_to_ptr.vmem [resolvable:$true] %s671_s6 }
  0x23   : > { %s4921_s1 = scalar_select %p4327_p4, 1, 0 }
  0x24   : > { %p3799_p6 = pneg %p4331_p5  ;;  %s47_s26 = sadd.s32 1, %s4151_s4 }
  0x25   : > { %s354_s2 = sadd.s32 1, %s4143_s29  ;;  %p48_p8 = scmp.ge.s32.totalorder %s47_s26, 2 }
  0x26   : > { %p4339_p7 = pnand %p3799_p6, %p4890_p1  ;;  %s3946_s27 = scalar_lea.vmem %s672_s6, 16 }
  0x27   : > { %p3947_p10 = scmp.ne.s32.totalorder %s672_s6, %s3946_s27  ;;  %s3953_s3 = scalar_lea.vmem %s672_s6, 32 }
  0x28   : > { %p3937_p9 = pneg %p4339_p7  ;;  %p3954_p13 = scmp.lt.s32.totalorder %s672_s6, %s672_s6 }
  0x29   : > { %p3955_p0 = scmp.lt.s32.totalorder %s3953_s3, %s3946_s27 }
  0x2a   : > { %p3949_p11 = pnand %p3947_p10, %p3937_p9 }
  0x2b   : > { %p3956_p2 = por %p3955_p0, %p3954_p13 }
  0x2c   : > { %p3950_p12 = pneg %p3949_p11 }
  0x2e   : > { %p3957_p3 = pnand %p3956_p2, %p3950_p12 }
  0x30   : > { %3960 = shalt.err (!%p3957_p3)
}
  0x31   : > { %s4924_s21 = sld [smem:[#allocation25_spill]]  ;;  %s4974_s26 = smov (%p48_p8, %s47_s26), 0 }
  0x32   : > { %4925 = sst [smem:[#allocation21_spill]] %s4974_s26  ;;  %p361_p6 = scmp.ne.s32.totalorder %s4143_s29, %s4139_s28 }
  0x33   : > { %p362_p10 = scmp.eq.s32.totalorder %s4155_s0, 0  ;;  %s351_s27 = ssub.s32 %s4151_s4, %s4974_s26 }
  0x34   : > { %p3819_p11 = scmp.lt.s32.totalorder %s4155_s0, 2  ;;  %p352_p12 = scmp.eq.s32.totalorder %s351_s27, 0 }
  0x35   : > { %p363_p13 = por %p362_p10, %p361_p6  ;;  %s752_s22 = sand.u32 1, %s4155_s0  }
  0x36   : > { %s754_s3 = sand.u32 1, %s4143_s29   ;;  %s3547_s19 = sshll.u32 %s4151_s4, 9 }
  0x37   : > { %3805 = dma.hbm_to_vmem [thread:$0]  (!%p4339_p7), %s4924_s21, 16, %s672_s6, [#allocation6]  }
  0x38   : > { %s4366_s24 = scalar_select %p352_p12, %s4143_s29, %s354_s2  }
  0x39   : > { %s4368_s20 = sshll.u32 %s754_s3, 5  ;;  %s4927_s12 = sld [smem:[#allocation32_spill]] }
  0x3a   : > { %4926 = sst [smem:[#allocation22_spill]] %s4366_s24  ;;  %s756_s6 = scalar_lea.vmem [#allocation8], %s4368_s20 }
  0x3b   : > { %s763_s15 = sshll.u32 %s756_s6, 4  ;;  %p4375_p8 = pnand %p3819_p11, %p363_p13  ;;  %s764_s15 = int_to_ptr.vmem [resolvable:$true] %s763_s15 }
  0x3c   : > { %s4379_s27 = scalar_lea.sflag [#allocation9], %s752_s22  ;;  %s3974_s2 = scalar_lea.vmem %s764_s15, 512 }
  0x3d   : > { %p4891_p0 = pneg %p4375_p8  ;;  %p3975_p2 = scmp.ne.s32.totalorder %s764_s15, %s3974_s2 }
  0x3e   : > { %s4158_s17 = smov [#allocation8]  }
  0x3f   : > { %s762_s21 = scalar_lea.hbm %s4927_s12, %s3547_s19  ;;  %p3977_p3 = pnand %p3975_p2, %p4891_p0 }
  0x40   : > { %s3979_s18 = sshll.u32 %s4158_s17, 4  ;;  %s3980_s18 = int_to_ptr.vmem [resolvable:$false] %s3979_s18 }
  0x41   : > { %p3978_p6 = pneg %p3977_p3  ;;  %s3981_s3 = scalar_lea.vmem %s3980_s18, 1024 }
  0x42   : > { %p3982_p10 = scmp.lt.s32.totalorder %s764_s15, %s3980_s18  ;;  %p3983_p11 = scmp.lt.s32.totalorder %s3981_s3, %s3974_s2 }
  0x44   : > { %p3984_p12 = por %p3983_p11, %p3982_p10 }
  0x46   : > { %p3985_p13 = pnand %p3984_p12, %p3978_p6 }
  0x48   : > { %3988 = shalt.err (!%p3985_p13)
}
  0x49   : > { %s4159_s6 = smov 128   ;;  %s4160_s22 = smov 8  }
  0x4a   : > { %3812 = dma.hbm_to_vmem [thread:$0]  (!%p4375_p8), %s762_s21, 512, %s764_s15, %s4379_s27, %s4159_s6, %s4159_s6, %s4160_s22  }
  0x4b   : > { %s4929_s16 = sld [smem:[#allocation36_spill]]  ;;  %s795_s2 = scalar_lea.vmem [#allocation10], %s4368_s20 }
  0x4c   : > { %s802_s18 = sshll.u32 %s795_s2, 4  ;;  %s4161_s3 = smov [#allocation2]   ;;  %s4398_s18 = int_to_ptr.vmem [resolvable:$true] %s802_s18 }
  0x4d   : > { %s660_s24 = sshll.u32 %s4161_s3, 4  ;;  %s4162_s29 = smov [#allocation7]   ;;  %s661_s24 = int_to_ptr.vmem [resolvable:$true] %s660_s24 }
  0x4e   : > { %s682_s0 = sshll.u32 %s4162_s29, 4  ;;  %s4000_s14 = scalar_lea.vmem %s661_s24, 128  ;;  %s683_s0 = int_to_ptr.vmem [resolvable:$true] %s682_s0 }
  0x4f   : > { %p4001_p2 = scmp.ne.s32.totalorder %s661_s24, %s4000_s14  ;;  %p4008_p10 = scmp.lt.s32.totalorder %s661_s24, %s661_s24 }
  0x50   : > { %p4009_p11 = scmp.lt.s32.totalorder %s4000_s14, %s4000_s14 }
  0x51   : > { %s4395_s4 = scalar_lea.hbm %s4929_s16, %s3547_s19  ;;  %p4003_p3 = pnand %p4001_p2, %p3937_p9 }
  0x52   : > { %p4010_p12 = por %p4009_p11, %p4008_p10 }
  0x53   : > { %p4004_p6 = pneg %p4003_p3 }
  0x55   : > { %p4011_p13 = pnand %p4010_p12, %p4004_p6 }
  0x57   : > { %4014 = shalt.err (!%p4011_p13)
}
  0x58   : > { %s4930_s19 = sld [smem:[#allocation24_spill]]  ;;  %s4026_s20 = scalar_lea.vmem %s683_s0, 16 }
  0x59   : > { %p4027_p1 = scmp.ne.s32.totalorder %s683_s0, %s4026_s20  ;;  %s4033_s29 = scalar_lea.vmem %s683_s0, 32 }
  0x5a   : > { %p4034_p3 = scmp.lt.s32.totalorder %s683_s0, %s683_s0  ;;  %p4035_p4 = scmp.lt.s32.totalorder %s4033_s29, %s4026_s20 }
  0x5b   : > { %p4029_p0 = pnand %p4027_p1, %p3937_p9 }
  0x5c   : > { %p4036_p10 = por %p4035_p4, %p4034_p3 }
  0x5d   : > { %p4030_p2 = pneg %p4029_p0 }
  0x5e   : > { %3802 = dma.hbm_to_vmem [thread:$0]  (!%p4339_p7), %s4930_s19, 128, %s661_s24, [#allocation3]  }
  0x5f   : > { %p4037_p6 = pnand %p4036_p10, %p4030_p2 }
  0x61   : > { %4040 = shalt.err (!%p4037_p6)
}
  0x62   : > { %s4931_s17 = sld [smem:[#allocation26_spill]]  ;;  %s4054_s24 = scalar_lea.vmem %s4398_s18, 512 }
  0x63   : > { %p4055_p11 = scmp.ne.s32.totalorder %s4398_s18, %s4054_s24  ;;  %p4932_p1 = pneg %p4375_p8 }
  0x64   : > { %s4163_s2 = smov [#allocation10]  }
  0x65   : > { %p4057_p9 = pnand %p4055_p11, %p4932_p1  ;;  %s4059_s3 = sshll.u32 %s4163_s2, 4  ;;  %s4060_s3 = int_to_ptr.vmem [resolvable:$false] %s4059_s3 }
  0x66   : > { %s4061_s12 = scalar_lea.vmem %s4060_s3, 1024  ;;  %p4062_p4 = scmp.lt.s32.totalorder %s4398_s18, %s4060_s3 }
  0x67   : > { %p4058_p0 = pneg %p4057_p9  ;;  %p4063_p12 = scmp.lt.s32.totalorder %s4061_s12, %s4054_s24 }
  0x68   : > { %3808 = dma.hbm_to_vmem [thread:$0]  (!%p4339_p7), %s4931_s17, 16, %s683_s0, [#allocation6]  }
  0x69   : > { %p4064_p13 = por %p4063_p12, %p4062_p4 }
  0x6b   : > { %p4065_p2 = pnand %p4064_p13, %p4058_p0 }
  0x6d   : > { %4068 = shalt.err (!%p4065_p2)
}
  0x6e   : > { %3815 = dma.hbm_to_vmem [thread:$0]  (!%p4375_p8), %s4395_s4, 512, %s4398_s18, %s4379_s27, %s4159_s6, %s4159_s6, %s4160_s22  }
  0x6f   : > { %846 = sbr.rel (%p4331_p5) target bundleno = 4274 (0x10b2), region = 108  ;;  %p4933_p7 = scmp.eq.s32.totalorder (!%p4331_p5), %s4319_s23, 0 }
  0x74   : > { %4118 = dma.done.wait (%p4933_p7), [#allocation3], 128   ;;  %p4934_p3 = pmov %p4933_p7 }
  0x76   : > { %4120 = vsyncadd (%p4934_p3), [#allocation3], 4294967168  ;;  %p4935_p10 = pmov %p4934_p3 }
  0x77   : > { %p4936_p6 = pmov %p4934_p3 }
  0x78   : > { %4122 = dma.done.wait (%p4935_p10), [#allocation6], 32  }
  0x79   : > { %4124 = vsyncadd (%p4936_p6), [#allocation6], 4294967264  ;;  %s860_s0 = sand.u32 1, %s4319_s23   ;;  %s862_s4 = sand.u32 1, %s4139_s28  }
  0x7a   : > { %s3482_s25 = sshll.u32 %s862_s4, 5  ;;  %s861_s5 = scalar_lea.sflag [#allocation9], %s860_s0 }
  0x7b   : > { %s4442_s26 = scalar_lea.vmem [#allocation8], %s3482_s25  ;;  %p4937_p5 = scmp.ne.s32.totalorder %s4921_s1, 0 }
  0x7d   : > { %4126 = dma.done.wait (%p4937_p5), %s861_s5, 1024  }
  0x7e   : > { %4128 = vsyncadd (%p4937_p5), %s861_s5, 4294966272  ;;  %p1015_p8 = scmp.lt.s32.totalorder %s4147_s30, 1  ;;  %s4938_s20 = sld [smem:[#allocation29_spill]] }
  0x7f   : > { %s4939_s8 = sld [smem:[#allocation30_spill]]  ;;  %s4514_s28 = scalar_lea.vmem [#allocation10], %s3482_s25 }
  0x80   : > { %s4450_s27 = scalar_select %p1015_p8, %s4147_s30, 1 }
  0x81   : > { %s4940_s10 = sld [smem:[#allocation31_spill]]  ;;  %p3492_p11 = scmp.ne.s32.totalorder %s4147_s30, 0 }
  0x82   : > { %s3549_s6 = sshll.u32 %s4450_s27, 5  ;;  %s4945_s1 = sld [smem:[#allocation38_spill]] }
  0x83   : > { %s4947_s21 = sld [smem:[#allocation40_spill]] }
  0x84   : > { %s4460_s29 = scalar_lea.vmem %s4938_s20, %s3549_s6  ;;  %s4946_s20 = sld [smem:[#allocation39_spill]] }
  0x85   : > { %s4465_s17 = scalar_lea.vmem %s4939_s8, %s3549_s6  ;;  %s4948_s2 = sld [smem:[#allocation41_spill]] }
  0x86   : > { %s4949_s12 = sld [smem:[#allocation23_spill]] (!%p3492_p11) }
  0x87   : > { %s4474_s4 = scalar_lea.vmem %s4940_s10, %s3549_s6  ;;  %s4944_s6 = sld [smem:[#allocation37_spill]] }
  0x88   : > { %s3552_s10 = sshll.u32 %s4450_s27, 6 }
  0x89   : > { %s4500_s22 = scalar_lea.vmem %s4945_s1, %s3552_s10  ;;  %s1061_s8 = scalar_lea.vmem %s4947_s21, %s4450_s27 }
  0x8a   : > { %s1058_s13 = scalar_lea.vmem %s4946_s20, %s4450_s27  ;;  %1069 = sbr.rel (%p3492_p11) target bundleno = 460 (0x1cc), region = 132 }
  0x8b   : > { %s1064_s3 = scalar_lea.vmem %s4948_s2, %s4450_s27 }
  0x8d   : > { %s1050_s0 = scalar_lea.vmem %s4944_s6, %s4450_s27 }
  0x8f   : > { %v1070_v0 = vld [vmem:[%s4949_s12] sm:$0xff]  ;;  %vm1077_vm0 = vcmask 261120   ;;  %v1071_v2 = vld [vmem:[%s4949_s12 + $0x8] sm:$0xff] }
  0x90   : > { %v1072_v1 = vld [vmem:[#allocation2] sm:$0xff]  ;;  %v3493_v24 = vld [vmem:[#allocation5] ss:$0 sm:$0xff]  ;;  %v3494_v26 = vld [vmem:[#allocation7] ss:$0 sm:$0xff] }
  0x91   : > { %v1073_v3 = vadd.f32 %v1072_v1, %v1070_v0  ;;  %v1074_v4 = vadd.f32 %v1072_v1, %v1071_v2 }
  0x93   : > { %v1078_v5 = vsel %vm1077_vm0, %v1073_v3, 0.0  ;;  %v1081_v6 = vsel %vm1077_vm0, %v1074_v4, 0.0 }
  0x94   : > { %1079 = vadd.xlane.f32.xlu0 %v1078_v5 }
  0x98   : > { %1082 = vadd.xlane.f32.xlu0 %v1081_v6 }
 0x11d   : > { %v1080_v7 = vpop.xlane.xlu0 %1079 }
 0x11e   : > { %v1085_v8 = vmul.f32 0.03125, %v1080_v7 }
 0x120   : > { %v1087_v9 = vsub.f32 %v1073_v3, %v1085_v8 }
 0x121   : > { %v1083_v10 = vpop.xlane.xlu0 %1082 }
 0x122   : > { %v1086_v11 = vmul.f32 0.03125, %v1083_v10  ;;  %v1089_v12 = vmul.f32 %v1087_v9, %v1087_v9 }
 0x124   : > { %v1088_v13 = vsub.f32 %v1074_v4, %v1086_v11  ;;  %v1091_v14 = vsel %vm1077_vm0, %v1089_v12, 0.0 }
 0x125   : > { %1092 = vadd.xlane.f32.xlu1 %v1091_v14 }
 0x126   : > { %v1090_v15 = vmul.f32 %v1088_v13, %v1088_v13 }
 0x128   : > { %v1094_v16 = vsel %vm1077_vm0, %v1090_v15, 0.0 }
 0x129   : > { %1095 = vadd.xlane.f32.xlu1 %v1094_v16 }
 0x1ae   : > { %v1093_v17 = vpop.xlane.xlu1 %1092 }
 0x1af   : > { %v1097_v18 = vmul.f32 0.03125, %v1093_v17 }
 0x1b1   : > { %v1099_v19 = vadd.f32 1e-06, %v1097_v18 }
 0x1b2   : > { %v1096_v20 = vpop.xlane.xlu1 %1095 }
 0x1b3   : > { %3889 = vrsqrt.f32 %v1099_v19  ;;  %v1098_v21 = vmul.f32 0.03125, %v1096_v20 }
 0x1b5   : > { %v1100_v22 = vadd.f32 1e-06, %v1098_v21 }
 0x1b7   : > { %3891 = vrsqrt.f32 %v1100_v22 }
 0x1c0   : > { %v3890_v23 = vpop.eup %3889 }
 0x1c1   : > { %v1103_v25 = vmul.f32 %v3890_v23, %v1087_v9 }
 0x1c3   : > { %v1111_v27 = vmul.f32 %v3493_v24, %v1103_v25 }
 0x1c4   : > { %v3892_v28 = vpop.eup %3891 }
 0x1c5   : > { %v1119_v29 = vadd.f32 %v3494_v26, %v1111_v27  ;;  %v1104_v30 = vmul.f32 %v3892_v28, %v1088_v13 }
 0x1c7   : > { %1121 = vst.msk [vmem:[#allocation11] sm:$0xff] %vm1077_vm0, %v1119_v29  ;;  %v1112_v31 = vmul.f32 %v3493_v24, %v1104_v30 }
 0x1c9   : > { %v1120_v32 = vadd.f32 %v3494_v26, %v1112_v31 }
 0x1cb   : > { %1122 = vst.msk [vmem:[#allocation11 + $0x8] sm:$0xff] %vm1077_vm0, %v1120_v32 }
 0x1cc PF: > { %v1132_v33 = vld [vmem:[%s4460_s29 + $0x18] sm:$0xff]  ;;  %v1131_v34 = vld [vmem:[%s4460_s29 + $0x10] sm:$0xff]  ;;  %vm1140_vm1 = vcmask 261120   ;;  %v1130_v36 = vld [vmem:[%s4460_s29 + $0x8] sm:$0xff]  ;;  %v4164_v43 = vmov 0.0   ;;  %vm4165_vm2 = vmmov 0   ;;  %s4951_s1 = scalar_lea.vmem %s4867_s7, %s4450_s27  ;;  %s4953_s2 = scalar_lea.vmem %s4871_s11, %s4450_s27 }
 0x1cd   : > { %3625 = vmatprep.subr.mxu1 %v1132_v33  ;;  %v1129_v37 = vld [vmem:[%s4460_s29] sm:$0xff]  ;;  %v1225_v39 = vld [vmem:[%s4465_s17 + $0x18] sm:$0xff]  ;;  %v1224_v40 = vld [vmem:[%s4465_s17 + $0x10] sm:$0xff]  ;;  %s4950_s29 = scalar_lea.vmem %s4869_s9, %s4450_s27  ;;  %vm1394_vm3 = vcmask 64512   ;;  %s4166_s15 = smov 120   ;;  %vm2764_vm4 = vcmask 195584  }
 0x1ce   : > { %v4531_v35 = vld [vmem:[#allocation11] sm:$0xff]  ;;  %3626 = vmatpush3.msra.mxu1 %v1132_v33  ;;  %v1222_v42 = vld [vmem:[%s4465_s17] sm:$0xff]  ;;  %v1311_v54 = vld [vmem:[%s4474_s4 + $0x18] sm:$0xff]  ;;  %s4952_s18 = sld [smem:[#allocation27_spill]]  ;;  %s4167_s23 = smov 112   ;;  %vm2761_vm5 = vcmask 130048  }
 0x1cf   : > { %3633 = vmatprep.mubr.msk.f32.mxu1 %vm1140_vm1, %v4531_v35  ;;  %3627 = vmatprep.subr.mxu1 %v1131_v34  ;;  %v1223_v41 = vld [vmem:[%s4465_s17 + $0x8] sm:$0xff]  ;;  %v3498_v46 = vld [vmem:[%s4950_s29] ss:$0 sm:$0xff]  ;;  %v1310_v55 = vld [vmem:[%s4474_s4 + $0x10] sm:$0xff]  ;;  %s4168_s10 = smov 104   ;;  %s4169_s20 = smov 8  }
 0x1d0   : > { %3655 = vmatprep.mubr.msk.f32.mxu0 %vm1140_vm1, %v4531_v35  ;;  %3628 = vmatpush3.msra.mxu1 %v1131_v34  ;;  %v3495_v49 = vld [vmem:[%s4951_s1] ss:$0 sm:$0xff]  ;;  %v1309_v56 = vld [vmem:[%s4474_s4 + $0x8] sm:$0xff]  ;;  %s4170_s6 = smov 16   ;;  %s4171_s30 = smov 24   ;;  %vm3027_vm6 = vcmask 523264  }
 0x1d1   : > { %3629 = vmatprep.subr.mxu1 %v1130_v36  ;;  %3647 = vmatprep.subr.mxu0 %v1311_v54  ;;  %v1308_v57 = vld [vmem:[%s4474_s4] sm:$0xff]  ;;  %s4954_s29 = sld [smem:[#allocation33_spill]] }
 0x1d2   : > { %3630 = vmatpush3.msra.mxu1 %v1130_v36  ;;  %v4539_v38 = vld [vmem:[#allocation11 + $0x8] sm:$0xff]  ;;  %3648 = vmatpush3.msra.mxu0 %v1311_v54  ;;  %v3501_v17 = vld [vmem:[%s4953_s2] ss:$0 sm:$0xff]  ;;  %s4957_s21 = sld [smem:[#allocation34_spill]] }
 0x1d3   : > { %3631 = vmatprep.subr.mxu1 %v1129_v37  ;;  %3649 = vmatprep.subr.mxu0 %v1310_v55 }
 0x1d4   : > { %3632 = vmatpush3.msra.mxu1 %v1129_v37  ;;  %3650 = vmatpush3.msra.mxu0 %v1310_v55  ;;  %v4602_v59 = vld [vmem:[%s4952_s18] ss:$0 sm:$0xff]  ;;  %v4608_v0 = vld [vmem:[%s4952_s18 + $0x1] ss:$0 sm:$0xff] }
 0x1d5   : > { %3634 = vmatmul.mubr.msk.f32.vlgmr.msra.gmra.mxu1 %vm1140_vm1, %v4539_v38  ;;  %3636 = vmatprep.subr.mxu1 %v1225_v39 }
 0x1d6   : > { %3637 = vmatpush3.msra.mxu1 %v1225_v39  ;;  %3644 = vmatprep.mubr.msk.f32.mxu1 %vm1140_vm1, %v4531_v35 }
 0x1d7   : > { %3638 = vmatprep.subr.mxu1 %v1224_v40  ;;  %3651 = vmatprep.subr.mxu0 %v1309_v56  ;;  %s4955_s17 = scalar_lea.vmem %s4954_s29, %s4450_s27 }
 0x1d8   : > { %3639 = vmatpush3.msra.mxu1 %v1224_v40  ;;  %3652 = vmatpush3.msra.mxu0 %v1309_v56  ;;  %s4958_s16 = scalar_lea.vmem %s4957_s21, %s4450_s27 }
 0x1d9   : > { %3640 = vmatprep.subr.mxu1 %v1223_v41  ;;  %3653 = vmatprep.subr.mxu0 %v1308_v57 }
 0x1da   : > { %3641 = vmatpush3.msra.mxu1 %v1223_v41  ;;  %3654 = vmatpush3.msra.mxu0 %v1308_v57 }
 0x1db   : > { %3642 = vmatprep.subr.mxu1 %v1222_v42  ;;  %3656 = vmatmul.mubr.msk.f32.vlgmr.msra.gmra.mxu0 %vm1140_vm1, %v4539_v38 }
 0x1dc   : > { %3643 = vmatpush3.msra.mxu1 %v1222_v42  ;;  %3668 = vmatprep.subr.mxu0 %v4164_v43 }
 0x1dd   : > { %3645 = vmatmul.mubr.msk.f32.vlgmr.msra.gmra.mxu1 %vm1140_vm1, %v4539_v38  ;;  %3658 = vmatprep.subr.mxu1 %v4164_v43 }
 0x1de   : > { %3660 = vmatprep.mubr.msk.f32.mxu1 %vm4165_vm2, %v4164_v43  ;;  %3670 = vmatprep.mubr.msk.f32.mxu0 %vm4165_vm2, %v4164_v43 }
 0x295   : > { %v3635_v44 = vpop.f32.mrf.mxu1 }
 0x296   : > { %v4583_v53 = vadd.f32 %v3635_v44, %v3495_v49 }
 0x297   : > { %v1213_v45 = vpop.f32.mrf.mxu1 }
 0x298   : > { %v4570_v52 = vadd.f32 %v3495_v49, %v1213_v45 }
 0x29b   : > { %v3657_v16 = vpop.f32.mrf.mxu0 }
 0x29c   : > { %v4622_v18 = vadd.f32 %v3657_v16, %v3501_v17 }
 0x29d   : > { %v3646_v47 = vpop.f32.mrf.mxu1  ;;  %v1385_v19 = vpop.f32.mrf.mxu0 }
 0x29e   : > { %v4559_v48 = vadd.f32 %v3646_v47, %v3498_v46  ;;  %v4625_v20 = vadd.f32 %v3501_v17, %v1385_v19 }
 0x29f   : > { %v1299_v50 = vpop.f32.mrf.mxu1 }
 0x2a0   : > { %v4566_v51 = vadd.f32 %v3498_v46, %v1299_v50  ;;  %1811 = vrot.lane.b32.xlu1 %v4559_v48, %s4166_s15  ;;  %3669 = vmatpush3.msra.mxu0 %v4625_v20 }
 0x2a1   : > { %3678 = vmatprep.subr.mxu0 %v4164_v43 }
 0x2a2   : > { %3659 = vmatpush3.xpose.msk.msra.mxu1 %vm1394_vm3, %v4566_v51 }
 0x2a3   : > { %3663 = vmatprep.subr.mxu1 %v4164_v43 }
 0x2a4   : > { %1731 = vrot.lane.b32.xlu1 %v4570_v52, %s4166_s15 }
 0x2a5   : > { %3661 = vmatmul.mubr.msk.f32.vlgmr.msra.gmra.mxu1 %vm1394_vm3, %v4570_v52 }
 0x2a6   : > { %3664 = vmatpush3.xpose.msk.msra.mxu1 %vm1394_vm3, %v4559_v48  ;;  %3665 = vmatprep.mubr.msk.f32.mxu1 %vm4165_vm2, %v4164_v43 }
 0x2a7   : > { %3673 = vmatprep.subr.mxu1 %v4164_v43 }
 0x2a9   : > { %3666 = vmatmul.mubr.msk.f32.vlgmr.msra.gmra.mxu1 %vm1394_vm3, %v4583_v53 }
 0x2aa   : > { %3675 = vmatprep.mubr.msk.f32.mxu1 %vm4165_vm2, %v4164_v43  ;;  %3674 = vmatpush3.msra.mxu1 %v4622_v18 }
 0x2ab   : > { %3683 = vmatprep.subr.mxu1 %v4164_v43 }
 0x312   : > { %v1812_v21 = vpop.permute.xlu1 %1811 }
 0x316   : > { %v1732_v22 = vpop.permute.xlu1 %1731 }
 0x365   : > { %v1467_v58 = vpop.f32.mrf.mxu1 }
 0x366   : > { %v1547_v60 = vmul.f32 0.35355338, %v1467_v58 }
 0x367   : > { %v3662_v61 = vpop.f32.mrf.mxu1 }
 0x368   : > { %v1561_v62 = vadd.f32 %v4602_v59, %v1547_v60 }
 0x369   : > { %v1543_v63 = vpop.f32.mrf.mxu1 }
 0x36a   : > { %v1548_v1 = vmul.f32 0.35355338, %v1543_v63  ;;  %v1563_v2 = vsel %vm1394_vm3, %v1561_v62, -inf }
 0x36b   : > { %1564 = vmax.xlane.f32.xlu0 %v1563_v2  ;;  %v3667_v3 = vpop.f32.mrf.mxu1 }
 0x36c   : > { %v1562_v4 = vadd.f32 %v4608_v0, %v1548_v1 }
 0x36e   : > { %v1566_v5 = vsel %vm1394_vm3, %v1562_v4, -inf }
 0x36f   : > { %1567 = vmax.xlane.f32.xlu0 %v1566_v5 }
 0x385   : > { %1733 = vrot.lane.b32.xlu0 %v4566_v51, %s4166_s15 }
 0x3f4   : > { %v1565_v6 = vpop.xlane.xlu0 %1564 }
 0x3f5   : > { %v1569_v7 = vsub.f32 %v1561_v62, %v1565_v6 }
 0x3f7   : > { %v1571_v8 = vmul.f32 1.442695, %v1569_v7 }
 0x3f8   : > { %v1568_v9 = vpop.xlane.xlu0 %1567 }
 0x3f9   : > { %3895 = vpow2.f32 %v1571_v8  ;;  %v1570_v10 = vsub.f32 %v1562_v4, %v1568_v9 }
 0x3fb   : > { %v1573_v11 = vmul.f32 1.442695, %v1570_v10 }
 0x3fc   : > { %v1734_v27 = vpop.permute.xlu0 %1733 }
 0x3fd   : > { %3897 = vpow2.f32 %v1573_v11 }
 0x406   : > { %v3896_v12 = vpop.eup %3895 }
 0x407   : > { %v1575_v13 = vsel %vm1394_vm3, %v3896_v12, 0.0 }
 0x408   : > { %1576 = vadd.xlane.f32.xlu1 %v1575_v13 }
 0x40a   : > { %v3898_v14 = vpop.eup %3897 }
 0x40b   : > { %v1578_v15 = vsel %vm1394_vm3, %v3898_v14, 0.0 }
 0x40c   : > { %1579 = vadd.xlane.f32.xlu1 %v1578_v15 }
 0x41d   : > { %1809 = vrot.lane.b32.xlu1 %v4583_v53, %s4166_s15 }
 0x491   : > { %v1577_v23 = vpop.xlane.xlu1 %1576 }
 0x492   : > { %3899 = vrcp.f32 %v1577_v23 }
 0x495   : > { %v1580_v24 = vpop.xlane.xlu1 %1579 }
 0x496   : > { %3901 = vrcp.f32 %v1580_v24 }
 0x499   : > { %v1810_v30 = vpop.permute.xlu1 %1809 }
 0x49f   : > { %v3900_v25 = vpop.eup %3899 }
 0x4a0   : > { %v1582_v26 = vmul.f32 %v3900_v25, %v3896_v12 }
 0x4a2   : > { %3671 = vmatmul.mubr.msk.f32.vlgmr.msra.gmra.mxu0 %vm1394_vm3, %v1582_v26 }
 0x4a3   : > { %v3902_v28 = vpop.eup %3901  ;;  %3679 = vmatpush3.xpose.msk.msra.mxu0 %vm1394_vm3, %v1734_v27  ;;  %3680 = vmatprep.mubr.msk.f32.mxu0 %vm4165_vm2, %v4164_v43 }
 0x4a4   : > { %v1584_v29 = vmul.f32 %v3902_v28, %v3898_v14  ;;  %3688 = vmatprep.subr.mxu0 %v4164_v43 }
 0x4a6   : > { %3676 = vmatmul.mubr.msk.f32.vlgmr.msra.gmra.mxu1 %vm1394_vm3, %v1584_v29  ;;  %3681 = vmatmul.mubr.msk.f32.vlgmr.msra.gmra.mxu0 %vm1394_vm3, %v1732_v22 }
 0x4a7   : > { %3684 = vmatpush3.xpose.msk.msra.mxu1 %vm1394_vm3, %v1812_v21  ;;  %3685 = vmatprep.mubr.msk.f32.mxu1 %vm4165_vm2, %v4164_v43 }
 0x4a8   : > { %3693 = vmatprep.subr.mxu1 %v4164_v43  ;;  %3690 = vmatprep.mubr.msk.f32.mxu0 %vm4165_vm2, %v4164_v43 }
 0x4aa   : > { %3686 = vmatmul.mubr.msk.f32.vlgmr.msra.gmra.mxu1 %vm1394_vm3, %v1810_v30 }
 0x4ab   : > { %3695 = vmatprep.mubr.msk.f32.mxu1 %vm4165_vm2, %v4164_v43 }
 0x562   : > { %v4648_v31 = vpop.f32.mrf.mxu0 }
 0x564   : > { %v3672_v32 = vpop.f32.mrf.mxu0 }
 0x566   : > { %v4650_v33 = vpop.f32.mrf.mxu1  ;;  %v1805_v34 = vpop.f32.mrf.mxu0 }
 0x567   : > { %v1887_v36 = vmul.f32 0.35355338, %v1805_v34 }
 0x568   : > { %v3677_v37 = vpop.f32.mrf.mxu1  ;;  %v3682_v39 = vpop.f32.mrf.mxu0 }
 0x569   : > { %v1889_v40 = vadd.f32 %v4602_v59, %v1887_v36 }
 0x56a   : > { %v1883_v41 = vpop.f32.mrf.mxu1 }
 0x56b   : > { %v1888_v42 = vmul.f32 0.35355338, %v1883_v41  ;;  %v1891_v44 = vsel %vm1394_vm3, %v1889_v40, -inf }
 0x56c   : > { %1892 = vmax.xlane.f32.xlu0 %v1891_v44  ;;  %v3687_v45 = vpop.f32.mrf.mxu1 }
 0x56d   : > { %v1890_v46 = vadd.f32 %v4608_v0, %v1888_v42 }
 0x56f   : > { %v1894_v47 = vsel %vm1394_vm3, %v1890_v46, -inf }
 0x570   : > { %1895 = vmax.xlane.f32.xlu1 %v1894_v47 }
 0x581   : > { %1991 = vrot.lane.b32.xlu1 %v4622_v18, %s4166_s15 }
 0x582   : > { %1914 = vrot.lane.b32.xlu0 %v4625_v20, %s4166_s15  ;;  %s4956_s15 = sld [smem:[#allocation28_spill]] }
 0x585   : > { %2069 = vrot.lane.b32.xlu1 %v4566_v51, %s4167_s23 }
 0x589   : > { %2147 = vrot.lane.b32.xlu1 %v4559_v48, %s4167_s23 }
 0x58d   : > { %2145 = vrot.lane.b32.xlu1 %v4583_v53, %s4167_s23 }
 0x5f5   : > { %v1893_v49 = vpop.xlane.xlu0 %1892 }
 0x5f6   : > { %v1897_v50 = vsub.f32 %v1889_v40, %v1893_v49 }
 0x5f8   : > { %v1899_v54 = vmul.f32 1.442695, %v1897_v50 }
 0x5f9   : > { %v1915_v55 = vpop.permute.xlu0 %1914  ;;  %v1896_v56 = vpop.xlane.xlu1 %1895 }
 0x5fa   : > { %3903 = vpow2.f32 %v1899_v54  ;;  %v1898_v57 = vsub.f32 %v1890_v46, %v1896_v56  ;;  %3689 = vmatpush3.msra.mxu0 %v1915_v55 }
 0x5fb   : > { %3698 = vmatprep.subr.mxu0 %v4164_v43 }
 0x5fc   : > { %v1901_v58 = vmul.f32 1.442695, %v1898_v57 }
 0x5fd   : > { %v1992_v60 = vpop.permute.xlu1 %1991 }
 0x5fe   : > { %3905 = vpow2.f32 %v1901_v58  ;;  %3694 = vmatpush3.msra.mxu1 %v1992_v60 }
 0x5ff   : > { %3703 = vmatprep.subr.mxu1 %v4164_v43 }
 0x601   : > { %v2070_v4 = vpop.permute.xlu1 %2069 }
 0x605   : > { %v2148_v8 = vpop.permute.xlu1 %2147 }
 0x607   : > { %v3904_v61 = vpop.eup %3903 }
 0x608   : > { %v1903_v62 = vsel %vm1394_vm3, %v3904_v61, 0.0 }
 0x609   : > { %1904 = vadd.xlane.f32.xlu0 %v1903_v62  ;;  %v2146_v11 = vpop.permute.xlu1 %2145 }
 0x60b   : > { %v3906_v63 = vpop.eup %3905 }
 0x60c   : > { %v1906_v1 = vsel %vm1394_vm3, %v3906_v63, 0.0 }
 0x60d   : > { %1907 = vadd.xlane.f32.xlu0 %v1906_v1 }
 0x623   : > { %2067 = vrot.lane.b32.xlu0 %v4570_v52, %s4167_s23 }
 0x692   : > { %v1905_v2 = vpop.xlane.xlu0 %1904 }
 0x693   : > { %3907 = vrcp.f32 %v1905_v2 }
 0x696   : > { %v1908_v3 = vpop.xlane.xlu0 %1907 }
 0x697   : > { %3909 = vrcp.f32 %v1908_v3 }
 0x69a   : > { %v2068_v10 = vpop.permute.xlu0 %2067 }
 0x6a0   : > { %v3908_v5 = vpop.eup %3907 }
 0x6a1   : > { %v1910_v6 = vmul.f32 %v3908_v5, %v3904_v61 }
 0x6a3   : > { %3691 = vmatmul.mubr.msk.f32.vlgmr.msra.gmra.mxu0 %vm1394_vm3, %v1910_v6 }
 0x6a4   : > { %v3910_v7 = vpop.eup %3909  ;;  %3699 = vmatpush3.xpose.msk.msra.mxu0 %vm1394_vm3, %v2070_v4  ;;  %3700 = vmatprep.mubr.msk.f32.mxu0 %vm4165_vm2, %v4164_v43 }
 0x6a5   : > { %v1912_v9 = vmul.f32 %v3910_v7, %v3906_v63  ;;  %3708 = vmatprep.subr.mxu0 %v4164_v43 }
 0x6a7   : > { %3696 = vmatmul.mubr.msk.f32.vlgmr.msra.gmra.mxu1 %vm1394_vm3, %v1912_v9  ;;  %3701 = vmatmul.mubr.msk.f32.vlgmr.msra.gmra.mxu0 %vm1394_vm3, %v2068_v10 }
 0x6a8   : > { %3704 = vmatpush3.xpose.msk.msra.mxu1 %vm1394_vm3, %v2148_v8  ;;  %3705 = vmatprep.mubr.msk.f32.mxu1 %vm4165_vm2, %v4164_v43 }
 0x6a9   : > { %3713 = vmatprep.subr.mxu1 %v4164_v43  ;;  %3710 = vmatprep.mubr.msk.f32.mxu0 %vm4165_vm2, %v4164_v43 }
 0x6ab   : > { %3706 = vmatmul.mubr.msk.f32.vlgmr.msra.gmra.mxu1 %vm1394_vm3, %v2146_v11 }
 0x6ac   : > { %3715 = vmatprep.mubr.msk.f32.mxu1 %vm4165_vm2, %v4164_v43 }
 0x763   : > { %v4688_v12 = vpop.f32.mrf.mxu0 }
 0x765   : > { %v3692_v13 = vpop.f32.mrf.mxu0 }
 0x767   : > { %v4690_v14 = vpop.f32.mrf.mxu1  ;;  %v2141_v15 = vpop.f32.mrf.mxu0 }
 0x768   : > { %v2223_v16 = vmul.f32 0.35355338, %v2141_v15 }
 0x769   : > { %v3697_v17 = vpop.f32.mrf.mxu1  ;;  %v3702_v19 = vpop.f32.mrf.mxu0 }
 0x76a   : > { %v2225_v21 = vadd.f32 %v4602_v59, %v2223_v16 }
 0x76b   : > { %v2219_v22 = vpop.f32.mrf.mxu1 }
 0x76c   : > { %v2224_v23 = vmul.f32 0.35355338, %v2219_v22  ;;  %v2227_v24 = vsel %vm1394_vm3, %v2225_v21, -inf }
 0x76d   : > { %2228 = vmax.xlane.f32.xlu0 %v2227_v24  ;;  %v3707_v25 = vpop.f32.mrf.mxu1  ;;  %v2769_v24 = vld [vmem:[%s4442_s26 + $0x10] sm:$0xff] }
 0x76e   : > { %v2226_v26 = vadd.f32 %v4608_v0, %v2224_v23  ;;  %v2770_v23 = vld [vmem:[%s4442_s26 + $0x18] sm:$0xff]  ;;  %v2767_v25 = vld [vmem:[%s4442_s26] sm:$0xff] }
 0x770   : > { %v2230_v27 = vsel %vm1394_vm3, %v2226_v26, -inf }
 0x771   : > { %2231 = vmax.xlane.f32.xlu1 %v2230_v27 }
 0x782   : > { %2325 = vrot.lane.b32.xlu1 %v4622_v18, %s4167_s23 }
 0x783   : > { %2249 = vrot.lane.b32.xlu0 %v4625_v20, %s4167_s23  ;;  %s4959_s23 = sld [smem:[#allocation35_spill]] }
 0x786   : > { %2403 = vrot.lane.b32.xlu1 %v4566_v51, %s4168_s10 }
 0x78a   : > { %2481 = vrot.lane.b32.xlu1 %v4559_v48, %s4168_s10 }
 0x78e   : > { %2479 = vrot.lane.b32.xlu1 %v4583_v53, %s4168_s10 }
 0x7f6   : > { %v2229_v28 = vpop.xlane.xlu0 %2228 }
 0x7f7   : > { %v2233_v29 = vsub.f32 %v2225_v21, %v2229_v28 }
 0x7f9   : > { %v2235_v30 = vmul.f32 1.442695, %v2233_v29 }
 0x7fa   : > { %v2250_v32 = vpop.permute.xlu0 %2249  ;;  %v2232_v34 = vpop.xlane.xlu1 %2231 }
 0x7fb   : > { %3911 = vpow2.f32 %v2235_v30  ;;  %v2234_v36 = vsub.f32 %v2226_v26, %v2232_v34  ;;  %3709 = vmatpush3.msra.mxu0 %v2250_v32 }
 0x7fc   : > { %3718 = vmatprep.subr.mxu0 %v4164_v43 }
 0x7fd   : > { %v2237_v37 = vmul.f32 1.442695, %v2234_v36 }
 0x7fe   : > { %v2326_v39 = vpop.permute.xlu1 %2325 }
 0x7ff   : > { %3913 = vpow2.f32 %v2237_v37  ;;  %3714 = vmatpush3.msra.mxu1 %v2326_v39 }
 0x800   : > { %3723 = vmatprep.subr.mxu1 %v4164_v43 }
 0x802   : > { %v2404_v44 = vpop.permute.xlu1 %2403 }
 0x806   : > { %v2482_v49 = vpop.permute.xlu1 %2481 }
 0x808   : > { %v3912_v48 = vpop.eup %3911 }
 0x809   : > { %v2239_v51 = vsel %vm1394_vm3, %v3912_v48, 0.0 }
 0x80a   : > { %2240 = vadd.xlane.f32.xlu0 %v2239_v51  ;;  %v2480_v54 = vpop.permute.xlu1 %2479 }
 0x80c   : > { %v3914_v53 = vpop.eup %3913 }
 0x80d   : > { %v2242_v40 = vsel %vm1394_vm3, %v3914_v53, 0.0 }
 0x80e   : > { %2243 = vadd.xlane.f32.xlu0 %v2242_v40 }
 0x824   : > { %2401 = vrot.lane.b32.xlu0 %v4570_v52, %s4168_s10 }
 0x893   : > { %v2241_v41 = vpop.xlane.xlu0 %2240 }
 0x894   : > { %3915 = vrcp.f32 %v2241_v41 }
 0x897   : > { %v2244_v42 = vpop.xlane.xlu0 %2243 }
 0x898   : > { %3917 = vrcp.f32 %v2244_v42 }
 0x89b   : > { %v2402_v52 = vpop.permute.xlu0 %2401 }
 0x8a1   : > { %v3916_v45 = vpop.eup %3915 }
 0x8a2   : > { %v2246_v46 = vmul.f32 %v3916_v45, %v3912_v48 }
 0x8a4   : > { %3711 = vmatmul.mubr.msk.f32.vlgmr.msra.gmra.mxu0 %vm1394_vm3, %v2246_v46 }
 0x8a5   : > { %v3918_v47 = vpop.eup %3917  ;;  %3719 = vmatpush3.xpose.msk.msra.mxu0 %vm1394_vm3, %v2404_v44  ;;  %3720 = vmatprep.mubr.msk.f32.mxu0 %vm4165_vm2, %v4164_v43 }
 0x8a6   : > { %v2248_v50 = vmul.f32 %v3918_v47, %v3914_v53  ;;  %3728 = vmatprep.subr.mxu0 %v4164_v43 }
 0x8a8   : > { %3716 = vmatmul.mubr.msk.f32.vlgmr.msra.gmra.mxu1 %vm1394_vm3, %v2248_v50  ;;  %3721 = vmatmul.mubr.msk.f32.vlgmr.msra.gmra.mxu0 %vm1394_vm3, %v2402_v52 }
 0x8a9   : > { %3724 = vmatpush3.xpose.msk.msra.mxu1 %vm1394_vm3, %v2482_v49  ;;  %3725 = vmatprep.mubr.msk.f32.mxu1 %vm4165_vm2, %v4164_v43 }
 0x8aa   : > { %3733 = vmatprep.subr.mxu1 %v4164_v43  ;;  %3730 = vmatprep.mubr.msk.f32.mxu0 %vm4165_vm2, %v4164_v43 }
 0x8ac   : > { %3726 = vmatmul.mubr.msk.f32.vlgmr.msra.gmra.mxu1 %vm1394_vm3, %v2480_v54  ;;  %v1126_v54 = vld [vmem:[%s4956_s15 + $0x8] sm:$0xff] }
 0x8ad   : > { %3735 = vmatprep.mubr.msk.f32.mxu1 %vm4165_vm2, %v4164_v43 }
 0x964   : > { %v2321_v55 = vpop.f32.mrf.mxu0 }
 0x966   : > { %v3712_v56 = vpop.f32.mrf.mxu0 }
 0x968   : > { %v2397_v57 = vpop.f32.mrf.mxu1  ;;  %v2475_v58 = vpop.f32.mrf.mxu0 }
 0x969   : > { %v2557_v60 = vmul.f32 0.35355338, %v2475_v58 }
 0x96a   : > { %v3717_v61 = vpop.f32.mrf.mxu1  ;;  %v3722_v62 = vpop.f32.mrf.mxu0 }
 0x96b   : > { %v2559_v63 = vadd.f32 %v4602_v59, %v2557_v60 }
 0x96c   : > { %v2553_v1 = vpop.f32.mrf.mxu1 }
 0x96d   : > { %v2558_v2 = vmul.f32 0.35355338, %v2553_v1  ;;  %v2561_v3 = vsel %vm1394_vm3, %v2559_v63, -inf }
 0x96e   : > { %2562 = vmax.xlane.f32.xlu0 %v2561_v3  ;;  %v3727_v4 = vpop.f32.mrf.mxu1  ;;  %v1125_v3 = vld [vmem:[%s4956_s15] sm:$0xff] }
 0x96f   : > { %v2560_v5 = vadd.f32 %v4608_v0, %v2558_v2  ;;  %v2921_v2 = vld [vmem:[%s4514_s28 + $0x18] sm:$0xff]  ;;  %v2920_v4 = vld [vmem:[%s4514_s28 + $0x10] sm:$0xff] }
 0x971   : > { %v2564_v6 = vsel %vm1394_vm3, %v2560_v5, -inf }
 0x972   : > { %2565 = vmax.xlane.f32.xlu1 %v2564_v6  ;;  %v2918_v6 = vld [vmem:[%s4514_s28] sm:$0xff] }
 0x983   : > { %2659 = vrot.lane.b32.xlu1 %v4622_v18, %s4168_s10 }
 0x987   : > { %2737 = vrot.lane.b32.xlu1 %v4688_v12, %s4169_s20 }
 0x98b   : > { %2739 = vrot.lane.b32.xlu1 %v4690_v14, %s4169_s20 }
 0x98f   : > { %2747 = vrot.lane.b32.xlu1 %v2397_v57, %s4170_s6 }
 0x9f7   : > { %v2563_v43 = vpop.xlane.xlu0 %2562 }
 0x9f8   : > { %v2567_v59 = vsub.f32 %v2559_v63, %v2563_v43  ;;  %v3019_v43 = vld [vmem:[%s4500_s22 + $0x38] sm:$0xff] }
 0x9fa   : > { %v2569_v7 = vmul.f32 1.442695, %v2567_v59  ;;  %v3018_v59 = vld [vmem:[%s4500_s22 + $0x30] sm:$0xff] }
 0x9fb   : > { %v2566_v8 = vpop.xlane.xlu1 %2565 }
 0x9fc   : > { %3919 = vpow2.f32 %v2569_v7  ;;  %v2568_v0 = vsub.f32 %v2560_v5, %v2566_v8  ;;  %v2919_v5 = vld [vmem:[%s4514_s28 + $0x8] sm:$0xff]  ;;  %v3017_v7 = vld [vmem:[%s4500_s22 + $0x28] sm:$0xff]  ;;  %v3016_v8 = vld [vmem:[%s4500_s22 + $0x20] sm:$0xff]  ;;  %s4173_s28 = smov [#allocation11]  }
 0x9fd   : > { %s3168_s4 = sshll.u32 %s4173_s28, 4  ;;  %s3169_s4 = int_to_ptr.vmem [resolvable:$true] %s3168_s4 }
 0x9fe   : > { %v2571_v9 = vmul.f32 1.442695, %v2568_v0  ;;  %p4076_p12 = scmp.lt.s32.totalorder %s3169_s4, %s3169_s4 }
 0x9ff   : > { %v2660_v10 = vpop.permute.xlu1 %2659 }
 0xa00   : > { %3921 = vpow2.f32 %v2571_v9  ;;  %3734 = vmatpush3.msra.mxu1 %v2660_v10 }
 0xa01   : > { %3749 = vmatprep.subr.mxu1 %v2921_v2 }
 0xa03   : > { %v2738_v30 = vpop.permute.xlu1 %2737 }
 0xa04   : > { %v2759_v36 = vsel %vm1394_vm3, %v4648_v31, %v2738_v30  ;;  %v3530_v31 = vld [vmem:[%s4955_s17] ss:$0 sm:$0xff]  ;;  %v3013_v30 = vld [vmem:[%s4500_s22 + $0x8] sm:$0xff] }
 0xa07   : > { %v2740_v32 = vpop.permute.xlu1 %2739 }
 0xa08   : > { %v2760_v53 = vsel %vm1394_vm3, %v4650_v33, %v2740_v32  ;;  %v3012_v32 = vld [vmem:[%s4500_s22] sm:$0xff] }
 0xa09   : > { %v3920_v18 = vpop.eup %3919 }
 0xa0a   : > { %v2573_v11 = vsel %vm1394_vm3, %v3920_v18, 0.0 }
 0xa0b   : > { %2574 = vadd.xlane.f32.xlu0 %v2573_v11  ;;  %v2748_v37 = vpop.permute.xlu1 %2747 }
 0xa0c   : > { %v2763_v40 = vsel %vm2761_vm5, %v2760_v53, %v2748_v37 }
 0xa0d   : > { %v3922_v12 = vpop.eup %3921 }
 0xa0e   : > { %v2576_v13 = vsel %vm1394_vm3, %v3922_v12, 0.0 }
 0xa0f   : > { %2577 = vadd.xlane.f32.xlu0 %v2576_v13 }
 0xa25   : > { %2583 = vrot.lane.b32.xlu0 %v4625_v20, %s4168_s10  ;;  %v2768_v20 = vld [vmem:[%s4442_s26 + $0x8] sm:$0xff]  ;;  %s4960_s10 = scalar_lea.vmem %s4959_s23, %s4450_s27 }
 0xa29   : > { %2745 = vrot.lane.b32.xlu0 %v2321_v55, %s4170_s6  ;;  %v4172_v55 = vmov 0  }
 0xa2a   : > { %3894 = vset.pattern.permute.xlu1 %v4172_v55  ;;  %3893 = vset.pattern.permute.xlu0 %v4172_v55 }
 0xa94   : > { %v2575_v14 = vpop.xlane.xlu0 %2574 }
 0xa95   : > { %3923 = vrcp.f32 %v2575_v14  ;;  %v3533_v14 = vld [vmem:[%s4958_s16] ss:$0 sm:$0xff] }
 0xa98   : > { %v2578_v15 = vpop.xlane.xlu0 %2577 }
 0xa99   : > { %3925 = vrcp.f32 %v2578_v15 }
 0xa9c   : > { %v2584_v16 = vpop.permute.xlu0 %2583 }
 0xa9d   : > { %3729 = vmatpush3.msra.mxu0 %v2584_v16 }
 0xa9e   : > { %3738 = vmatprep.subr.mxu0 %v2770_v23 }
 0xaa0   : > { %v2746_v34 = vpop.permute.xlu0 %2745 }
 0xaa1   : > { %v2762_v39 = vsel %vm2761_vm5, %v2759_v36, %v2746_v34  ;;  %v3535_v34 = vld [vmem:[%s1050_s0] ss:$0 sm:$0xff] }
 0xaa2   : > { %v3924_v17 = vpop.eup %3923 }
 0xaa3   : > { %v2580_v19 = vmul.f32 %v3924_v17, %v3920_v18 }
 0xaa5   : > { %3731 = vmatmul.mubr.msk.f32.vlgmr.msra.gmra.mxu0 %vm1394_vm3, %v2580_v19  ;;  %v3534_v19 = vld [vmem:[%s4960_s10] ss:$0 sm:$0xff] }
 0xaa6   : > { %v3926_v21 = vpop.eup %3925  ;;  %3739 = vmatpush3.msra.mxu0 %v2770_v23 }
 0xaa7   : > { %v2582_v22 = vmul.f32 %v3926_v21, %v3922_v12  ;;  %3740 = vmatprep.subr.mxu0 %v2769_v24 }
 0xaa8   : > { %3741 = vmatpush3.msra.mxu0 %v2769_v24 }
 0xaa9   : > { %3736 = vmatmul.mubr.msk.f32.vlgmr.msra.gmra.mxu1 %vm1394_vm3, %v2582_v22  ;;  %3742 = vmatprep.subr.mxu0 %v2768_v20 }
 0xaaa   : > { %3743 = vmatpush3.msra.mxu0 %v2768_v20  ;;  %3750 = vmatpush3.msra.mxu1 %v2921_v2 }
 0xaab   : > { %3744 = vmatprep.subr.mxu0 %v2767_v25  ;;  %3751 = vmatprep.subr.mxu1 %v2920_v4 }
 0xaac   : > { %3745 = vmatpush3.msra.mxu0 %v2767_v25  ;;  %3752 = vmatpush3.msra.mxu1 %v2920_v4  ;;  %v3541_v4 = vld [vmem:[%s1061_s8] ss:$0 sm:$0xff]  ;;  %s4069_s8 = scalar_lea.vmem %s3169_s4, 256 }
 0xaad   : > { %3753 = vmatprep.subr.mxu1 %v2919_v5  ;;  %3760 = vmatprep.subr.mxu0 %v3019_v43  ;;  %p4070_p9 = scmp.ne.s32.totalorder %s3169_s4, %s4069_s8  ;;  %p4077_p13 = scmp.lt.s32.totalorder %s4069_s8, %s4069_s8 }
 0xaae   : > { %3754 = vmatpush3.msra.mxu1 %v2919_v5 }
 0xaaf   : > { %3755 = vmatprep.subr.mxu1 %v2918_v6  ;;  %p4078_p2 = por %p4077_p13, %p4076_p12 }
 0xab0   : > { %3756 = vmatpush3.msra.mxu1 %v2918_v6  ;;  %v3542_v6 = vld [vmem:[%s1064_s3] ss:$0 sm:$0xff] }
 0xb65   : > { %v2655_v26 = vpop.f32.mrf.mxu0 }
 0xb66   : > { %2753 = vrot.lane.b32.xlu0 %v2655_v26, %s4171_s30 }
 0xb67   : > { %v3732_v27 = vpop.f32.mrf.mxu0 }
 0xb69   : > { %v2731_v28 = vpop.f32.mrf.mxu1 }
 0xb6a   : > { %2755 = vrot.lane.b32.xlu1 %v2731_v28, %s4171_s30  ;;  %v3015_v28 = vld [vmem:[%s4500_s22 + $0x18] sm:$0xff] }
 0xb6b   : > { %v3737_v29 = vpop.f32.mrf.mxu1 }
 0xb6c   : > { %v3014_v29 = vld [vmem:[%s4500_s22 + $0x10] sm:$0xff] }
 0xbd8   : > { %v2754_v48 = vpop.permute.xlu0 %2753 }
 0xbd9   : > { %v2765_v51 = vsel %vm2764_vm4, %v2762_v39, %v2754_v48 }
 0xbda   : > { %3746 = vmatprep.mubr.msk.f32.mxu0 %vm1140_vm1, %v2765_v51 }
 0xbdc   : > { %v2756_v41 = vpop.permute.xlu1 %2755 }
 0xbdd   : > { %v2766_v42 = vsel %vm2764_vm4, %v2763_v40, %v2756_v41  ;;  %v3538_v40 = vld [vmem:[%s1058_s13] ss:$0 sm:$0xff]  ;;  %s4963_s13 = sld [smem:[#allocation20_spill]] }
 0xbde   : > { %3747 = vmatmul.mubr.msk.f32.vlgmr.msra.gmra.mxu0 %vm1140_vm1, %v2766_v42 }
 0xbdf   : > { %3761 = vmatpush3.msra.mxu0 %v3019_v43 }
 0xbe0   : > { %3762 = vmatprep.subr.mxu0 %v3018_v59 }
 0xbe1   : > { %3763 = vmatpush3.msra.mxu0 %v3018_v59 }
 0xbe2   : > { %3764 = vmatprep.subr.mxu0 %v3017_v7 }
 0xbe3   : > { %3765 = vmatpush3.msra.mxu0 %v3017_v7  ;;  %p3823_p1 = scmp.eq.s32.totalorder %s4963_s13, 1 }
 0xbe4   : > { %3766 = vmatprep.subr.mxu0 %v3016_v8 }
 0xbe5   : > { %3767 = vmatpush3.msra.mxu0 %v3016_v8  ;;  %p4071_p0 = pnand %p4070_p9, %p3823_p1 }
 0xbe6   : > { %3768 = vmatprep.subr.mxu0 %v3015_v28 }
 0xbe7   : > { %3769 = vmatpush3.msra.mxu0 %v3015_v28  ;;  %p4072_p4 = pneg %p4071_p0 }
 0xbe8   : > { %3770 = vmatprep.subr.mxu0 %v3014_v29 }
 0xbe9   : > { %3771 = vmatpush3.msra.mxu0 %v3014_v29  ;;  %p4079_p7 = pnand %p4078_p2, %p4072_p4 }
 0xbea   : > { %3772 = vmatprep.subr.mxu0 %v3013_v30 }
 0xbeb   : > { %3773 = vmatpush3.msra.mxu0 %v3013_v30 }
 0xbec   : > { %3774 = vmatprep.subr.mxu0 %v3012_v32 }
 0xbed   : > { %3775 = vmatpush3.msra.mxu0 %v3012_v32 }
 0xc9e   : > { %v3748_v44 = vpop.f32.mrf.mxu0 }
 0xc9f   : > { %v2856_v45 = vadd.f32 %v3748_v44, %v3530_v31 }
 0xca0   : > { %v2850_v46 = vpop.f32.mrf.mxu0 }
 0xca1   : > { %v2851_v47 = vadd.f32 %v3530_v31, %v2850_v46  ;;  %v2860_v49 = vadd.f32 %v2856_v45, %v4539_v38 }
 0xca3   : > { %v2866_v50 = vsel %vm1140_vm1, %v2860_v49, 0.0  ;;  %v2859_v33 = vadd.f32 %v2851_v47, %v4531_v35 }
 0xca4   : > { %2867 = vadd.xlane.f32.xlu1 %v2866_v50 }
 0xca5   : > { %v2863_v52 = vsel %vm1140_vm1, %v2859_v33, 0.0 }
 0xca6   : > { %2864 = vadd.xlane.f32.xlu0 %v2863_v52 }
 0xcb5   : > { %2913 = vperm.xlu1 %3894, %v1126_v54  }
 0xd2d   : > { %v2868_v56 = vpop.xlane.xlu1 %2867 }
 0xd2e   : > { %v2871_v57 = vmul.f32 0.03125, %v2868_v56 }
 0xd2f   : > { %v2865_v38 = vpop.xlane.xlu0 %2864 }
 0xd30   : > { %v2873_v58 = vsub.f32 %v2860_v49, %v2871_v57  ;;  %v2870_v35 = vmul.f32 0.03125, %v2865_v38 }
 0xd31   : > { %v4791_v20 = vpop.permute.xlu1 %2913 }
 0xd32   : > { %v2872_v60 = vsub.f32 %v2859_v33, %v2870_v35  ;;  %v2875_v61 = vmul.f32 %v2873_v58, %v2873_v58 }
 0xd34   : > { %v2879_v62 = vsel %vm1140_vm1, %v2875_v61, 0.0  ;;  %v2874_v63 = vmul.f32 %v2872_v60, %v2872_v60 }
 0xd35   : > { %2880 = vadd.xlane.f32.xlu0 %v2879_v62 }
 0xd36   : > { %v2876_v1 = vsel %vm1140_vm1, %v2874_v63, 0.0 }
 0xd39   : > { %2877 = vadd.xlane.f32.xlu0 %v2876_v1 }
 0xd4f   : > { %2908 = vperm.xlu0 %3893, %v1125_v3  }
 0xdbe   : > { %v2881_v0 = vpop.xlane.xlu0 %2880 }
 0xdbf   : > { %v2883_v9 = vmul.f32 0.03125, %v2881_v0 }
 0xdc1   : > { %v2885_v10 = vadd.f32 1e-06, %v2883_v9 }
 0xdc2   : > { %v2878_v18 = vpop.xlane.xlu0 %2877 }
 0xdc3   : > { %3927 = vrsqrt.f32 %v2885_v10  ;;  %v2882_v11 = vmul.f32 0.03125, %v2878_v18 }
 0xdc5   : > { %v2884_v12 = vadd.f32 1e-06, %v2882_v11 }
 0xdc7   : > { %3929 = vrsqrt.f32 %v2884_v12 }
 0xdca   : > { %v4789_v24 = vpop.permute.xlu0 %2908 }
 0xdd0   : > { %v3928_v13 = vpop.eup %3927 }
 0xdd1   : > { %v2889_v15 = vmul.f32 %v3928_v13, %v2873_v58 }
 0xdd3   : > { %v2897_v17 = vmul.f32 %v3533_v14, %v2889_v15 }
 0xdd4   : > { %v3930_v16 = vpop.eup %3929 }
 0xdd5   : > { %v2888_v21 = vmul.f32 %v3930_v16, %v2872_v60  ;;  %v2905_v23 = vadd.f32 %v3534_v19, %v2897_v17 }
 0xdd7   : > { %v2896_v22 = vmul.f32 %v3533_v14, %v2888_v21  ;;  %v2917_v27 = vmul.f32 %v4791_v20, %v2905_v23 }
 0xdd9   : > { %v2904_v25 = vadd.f32 %v3534_v19, %v2896_v22 }
 0xddb   : > { %v2916_v26 = vmul.f32 %v4789_v24, %v2904_v25 }
 0xddd   : > { %3757 = vmatprep.mubr.msk.f32.mxu1 %vm1140_vm1, %v2916_v26 }
 0xdde   : > { %3758 = vmatmul.mubr.msk.f32.vlgmr.msra.gmra.mxu1 %vm1140_vm1, %v2917_v27 }
 0xe9e   : > { %v3759_v36 = vpop.f32.mrf.mxu1 }
 0xe9f   : > { %v3007_v37 = vadd.f32 %v3759_v36, %v3535_v34 }
 0xea0   : > { %v3001_v39 = vpop.f32.mrf.mxu1 }
 0xea1   : > { %v3002_v48 = vadd.f32 %v3535_v34, %v3001_v39  ;;  %v3011_v53 = vmax.f32 %v3007_v37, 0.0 }
 0xea3   : > { %v3010_v51 = vmax.f32 %v3002_v48, 0.0 }
 0xea5   : > { %3776 = vmatprep.mubr.msk.f32.mxu0 %vm3027_vm6, %v3010_v51 }
 0xea6   : > { %3777 = vmatmul.mubr.msk.f32.vlgmr.msra.gmra.mxu0 %vm3027_vm6, %v3011_v53 }
 0xf66   : > { %v3778_v41 = vpop.f32.mrf.mxu0 }
 0xf67   : > { %v3106_v42 = vadd.f32 %v3778_v41, %v3538_v40 }
 0xf68   : > { %v3100_v31 = vpop.f32.mrf.mxu0 }
 0xf69   : > { %v3101_v44 = vadd.f32 %v3538_v40, %v3100_v31  ;;  %v3110_v45 = vadd.f32 %v3106_v42, %v2917_v27 }
 0xf6b   : > { %v3116_v46 = vsel %vm1140_vm1, %v3110_v45, 0.0  ;;  %v3109_v47 = vadd.f32 %v3101_v44, %v2916_v26 }
 0xf6c   : > { %3117 = vadd.xlane.f32.xlu0 %v3116_v46 }
 0xf6d   : > { %v3113_v49 = vsel %vm1140_vm1, %v3109_v47, 0.0 }
 0xf6e   : > { %3114 = vadd.xlane.f32.xlu1 %v3113_v49 }
 0xff5   : > { %v3118_v50 = vpop.xlane.xlu0 %3117 }
 0xff6   : > { %v3120_v33 = vmul.f32 0.03125, %v3118_v50 }
 0xff7   : > { %v3115_v52 = vpop.xlane.xlu1 %3114 }
 0xff8   : > { %v3119_v54 = vmul.f32 0.03125, %v3115_v52  ;;  %v3122_v55 = vsub.f32 %v3110_v45, %v3120_v33 }
 0xffa   : > { %v3121_v56 = vsub.f32 %v3109_v47, %v3119_v54  ;;  %v3124_v58 = vmul.f32 %v3122_v55, %v3122_v55 }
 0xffc   : > { %v3123_v57 = vmul.f32 %v3121_v56, %v3121_v56  ;;  %v3128_v35 = vsel %vm1140_vm1, %v3124_v58, 0.0 }
 0xffe   : > { %v3125_v38 = vsel %vm1140_vm1, %v3123_v57, 0.0 }
 0xfff   : > { %3126 = vadd.xlane.f32.xlu1 %v3125_v38 }
0x1003   : > { %3129 = vadd.xlane.f32.xlu1 %v3128_v35 }
0x1088   : > { %v3127_v60 = vpop.xlane.xlu1 %3126 }
0x1089   : > { %v3131_v61 = vmul.f32 0.03125, %v3127_v60 }
0x108b   : > { %v3133_v62 = vadd.f32 1e-06, %v3131_v61 }
0x108c   : > { %v3130_v63 = vpop.xlane.xlu1 %3129 }
0x108d   : > { %3931 = vrsqrt.f32 %v3133_v62  ;;  %v3132_v1 = vmul.f32 0.03125, %v3130_v63 }
0x108f   : > { %v3134_v2 = vadd.f32 1e-06, %v3132_v1 }
0x1091   : > { %3933 = vrsqrt.f32 %v3134_v2 }
0x109a   : > { %v3932_v3 = vpop.eup %3931 }
0x109b   : > { %v3137_v5 = vmul.f32 %v3932_v3, %v3121_v56 }
0x109d   : > { %v3145_v43 = vmul.f32 %v3541_v4, %v3137_v5 }
0x109e   : > { %v3934_v59 = vpop.eup %3933 }
0x109f   : > { %v3138_v7 = vmul.f32 %v3934_v59, %v3122_v55  ;;  %v3153_v8 = vadd.f32 %v3542_v6, %v3145_v43 }
0x10a1   : > { %v3146_v0 = vmul.f32 %v3541_v4, %v3138_v7  ;;  %v3155_v9 = vmul.f32 %v3153_v8, %v4789_v24 }
0x10a3   : > { %v3154_v10 = vadd.f32 %v3542_v6, %v3146_v0  ;;  %3157 = vst.msk [vmem:[#allocation11] sm:$0xff] %vm1140_vm1, %v3155_v9 }
0x10a5   : > { %v3156_v18 = vmul.f32 %v3154_v10, %v4791_v20 }
0x10a7   : > { %3158 = vst.msk [vmem:[#allocation11 + $0x8] sm:$0xff] %vm1140_vm1, %v3156_v18 }
0x10a8   : > { %4082 = shalt.err (!%p4079_p7)
}
0x10a9   : > { %s4174_s27 = smov 128   ;;  %s4966_s16 = sld [smem:[#allocation42_spill]] }
0x10af   : > { %3796 = dma.vmem_to_hbm [thread:$0]  (%p3823_p1), %s3169_s4, 256, %s4966_s16, [#allocation4], %s4174_s27, %s4174_s27, %s4169_s20  }
0x10b0   : > { %4130 = dma.done.wait (%p3823_p1), [#allocation4], 256  }
0x10b1   : > { %4132 = vsyncadd (%p3823_p1), [#allocation4], 4294967040 }
0x10b2 PF: > { %s4967_s24 = sld [smem:[#allocation19_spill]] }
0x10b3   : > { %s4968_s3 = sld [smem:[#allocation16_spill]] }
0x10b4   : > { %s4969_s28 = sld [smem:[#allocation17_spill]] }
0x10b5   : > { %s4970_s29 = sld [smem:[#allocation22_spill]] }
0x10b6   : > { %s4971_s30 = sld [smem:[#allocation18_spill]] }
0x10b7   : > { %s4972_s4 = sld [smem:[#allocation21_spill]] }
0x10b8   : > { %s38_s0 = sadd.s32 1, %s4967_s24  }
0x10b9   : > { %p35_p3 = scmp.ge.s32.totalorder %s38_s0, 4  }
0x10bb   :  { %37 = sbr.rel (!%p35_p3) target bundleno = 28 (0x1c), region = 225 }
0x10c0   :  { %3184 = vsyncpa [#allocation3], 1 }
0x10c1   :  { %3186 = vsyncpa [#allocation3 + $0x1], 1 }
0x10c2   :  { %3187 = vsyncpa [#allocation6], 1 }
0x10c3   :  { %3188 = vsyncpa [#allocation9], 1 }
0x10c4   :  { %3190 = vsyncpa [#allocation9 + $0x1], 1 }
0x10c5   :  { %3191 = vsyncpa [#allocation4], 1 }
0x10c6   :  { %3193 = vsyncpa [#allocation4 + $0x1], 1 }

</bundles_post_ra>
